<compile_context>
chip_gen: v5e
topology: v5e:2x2
jax: 0.10.0
libtpu: 0.0.40
codegen_flags: <defaults>
</compile_context>

<pallas_src>
import functools
import math

import jax
import jax.numpy as jnp
from jax import lax
from jax.experimental import pallas as pl

# ---- model hyper-parameters (small, consistent with the module) -------------
NUM_LAYERS = 2
D_MODEL = 32
NHEAD = 4
HEAD_DIM = D_MODEL // NHEAD
DIM_FF = 64
MAX_LEN = 16
LN_EPS = 1e-5

BATCH = 2
SEQ = 8

W_LANES = 3 * D_MODEL                              # 96 lanes for every packed slab
W_ROWS_PER_LAYER = 3 * D_MODEL + DIM_FF            # w_qkv(32) + wo(32) + w1(32) + w2(64)
VEC_ROWS = 8                                       # biases + LN params per layer


# ---- Pallas kernel: full block (pos-emb + all layers + all batch rows) ------
def fused_block_kernel(x_ref, mask_ref, w_ref, misc_ref, out_ref, *, seq):
    """x_ref    : (B*S, D)  f32 activations, batch flattened into sublanes
       mask_ref : (1, B*S)  f32, 1.0 = padded position
       w_ref    : (NUM_LAYERS*160, 96) bf16 packed matmul weights
       misc_ref : (MAX_LEN + 8*NUM_LAYERS, 96) f32: pos_table[1:] + per-layer vec
       out_ref  : (B*S, D)  f32"""
    BS, D = x_ref.shape
    batch = BS // seq
    num_layers = w_ref.shape[0] // W_ROWS_PER_LAYER
    scale = jnp.float32(1.0 / math.sqrt(HEAD_DIM))

    # ---- masks & positional embedding built once, in-kernel --------------------
    mask_row = mask_ref[...]                                        # (1, BS)
    ridx = lax.broadcasted_iota(jnp.int32, (BS, BS), 0)
    cidx = lax.broadcasted_iota(jnp.int32, (BS, BS), 1)
    inv_s = jnp.float32(1.0 / seq)
    rbatch = jnp.floor(ridx.astype(jnp.float32) * inv_s)            # query batch id
    cbatch = jnp.floor(cidx.astype(jnp.float32) * inv_s)            # key batch id
    key_ok = jnp.broadcast_to(mask_row == 0.0, (BS, BS))
    visible = (rbatch == cbatch) & (cidx <= ridx) & key_ok
    bias = jnp.where(visible, 0.0, jnp.float32(-1e9))               # reused every layer

    # padded-query flag as a (BS,1) column via diagonal extraction (avoids a
    # lane->sublane transpose of the tiny mask vector)
    eye = ridx == cidx
    q_padded = jnp.sum(jnp.where(eye, jnp.broadcast_to(mask_row, (BS, BS)), 0.0),
                       axis=1, keepdims=True)                       # (BS, 1)

    # positional embedding: misc rows 0..seq-1 hold pos_table[1..seq]; padded rows
    # map to embedding row 0 (all zeros) -> multiply by (1 - padded)
    pe_seq = misc_ref[0:seq, 0:D]                                   # (S, D) f32
    pe = jnp.concatenate([pe_seq] * batch, axis=0)                  # (BS, D)
    h = x_ref[...] + pe * (1.0 - q_padded)

    def layer_norm(v, w, b):
        mu = jnp.mean(v, axis=-1, keepdims=True)
        var = jnp.mean(jnp.square(v - mu), axis=-1, keepdims=True)
        return (v - mu) * lax.rsqrt(var + LN_EPS) * w + b

    for l in range(num_layers):                                     # static unrolled
        wb = l * W_ROWS_PER_LAYER
        vb = MAX_LEN + VEC_ROWS * l
        w_qkv = w_ref[wb:wb + D, :]                                 # (D, 3D)  bf16
        wo    = w_ref[wb + D:wb + 2 * D, 0:D]                       # (D, D)   bf16
        w1    = w_ref[wb + 2 * D:wb + 3 * D, 0:DIM_FF]              # (D, FF)  bf16
        w2    = w_ref[wb + 3 * D:wb + 3 * D + DIM_FF, 0:D]          # (FF, D)  bf16
        vec   = misc_ref[vb:vb + VEC_ROWS, :]                       # (8, 3D)  f32
        b_qkv = vec[0:1, :]                                         # [bq | bk | bv]
        bo    = vec[1:2, 0:D]
        b1    = vec[2:3, 0:DIM_FF]
        b2    = vec[3:4, 0:D]
        ln1w, ln1b = vec[4:5, 0:D], vec[5:6, 0:D]
        ln2w, ln2b = vec[6:7, 0:D], vec[7:8, 0:D]

        # packed QKV projection: bf16 operands, f32 accumulation (single MXU pass)
        qkv = jnp.dot(h.astype(jnp.bfloat16), w_qkv,
                      preferred_element_type=jnp.float32) + b_qkv   # (BS, 3D) f32
        q_bf = qkv[:, 0:D].astype(jnp.bfloat16)
        v_bf = qkv[:, 2 * D:3 * D].astype(jnp.bfloat16)
        # ONE K transpose per layer; per-head K^T is then a sublane slice
        kT_bf = jnp.transpose(qkv[:, D:2 * D]).astype(jnp.bfloat16)  # (D, BS)

        # per-head attention; output projection accumulated per head so head
        # outputs are never concatenated along the lane axis
        attn = jnp.zeros((BS, D), jnp.float32)
        for hd in range(NHEAD):                                     # static unrolled
            lo = hd * HEAD_DIM
            s = jnp.dot(q_bf[:, lo:lo + HEAD_DIM], kT_bf[lo:lo + HEAD_DIM, :],
                        preferred_element_type=jnp.float32) * scale + bias
            m = jnp.max(s, axis=-1, keepdims=True)                  # safe softmax
            p = jnp.exp(s - m)
            p = p / jnp.sum(p, axis=-1, keepdims=True)              # exact divide
            head_out = jnp.dot(p.astype(jnp.bfloat16), v_bf[:, lo:lo + HEAD_DIM],
                               preferred_element_type=jnp.float32)
            attn = attn + jnp.dot(head_out.astype(jnp.bfloat16),
                                  wo[lo:lo + HEAD_DIM, :],
                                  preferred_element_type=jnp.float32)

        y = layer_norm(h + attn + bo, ln1w, ln1b)                   # post-LN 1
        ff = jnp.maximum(
            jnp.dot(y.astype(jnp.bfloat16), w1,
                    preferred_element_type=jnp.float32) + b1, 0.0)
        ff = jnp.dot(ff.astype(jnp.bfloat16), w2,
                     preferred_element_type=jnp.float32) + b2
        h = layer_norm(y + ff, ln2w, ln2b)                          # post-LN 2

    out_ref[...] = h.astype(out_ref.dtype)                          # one full-slab store


# ---- wrapper -----------------------------------------------------------------
def item_based_attention_block(x, mask, w_slab, misc_slab):
    """x: (B, S, D) f32; mask: (B, S) bool, True = padded position."""
    B, S, D = x.shape
    BS = B * S
    x_flat = x.reshape(BS, D).astype(jnp.float32)
    mask_f = mask.reshape(1, BS).astype(jnp.float32)                # only wrapper-side prep
    out_flat = pl.pallas_call(
        functools.partial(fused_block_kernel, seq=S),
        out_shape=jax.ShapeDtypeStruct((BS, D), jnp.float32),
    )(x_flat, mask_f, w_slab, misc_slab)
    return out_flat.reshape(B, S, D)


# ---- parameter construction (deterministic, synthetic) ------------------------
def init_params(key):
    def rnd(k, shape, scale=0.1):
        return scale * jax.random.normal(k, shape, jnp.float32)

    keys = jax.random.split(key, NUM_LAYERS * 8 + 1)
    layers = []
    for l in range(NUM_LAYERS):
        k = keys[l * 8:(l + 1) * 8]
        wq = rnd(k[0], (D_MODEL, D_MODEL))
        wk = rnd(k[1], (D_MODEL, D_MODEL))
        wv = rnd(k[2], (D_MODEL, D_MODEL))
        wo = rnd(k[3], (D_MODEL, D_MODEL))
        w1 = rnd(k[4], (D_MODEL, DIM_FF))
        w2 = rnd(k[5], (DIM_FF, D_MODEL))
        bq = rnd(k[6], (1, D_MODEL), 0.02)
        bk = jnp.zeros((1, D_MODEL), jnp.float32)
        bv = rnd(k[7], (1, D_MODEL), 0.02)
        bo = jnp.zeros((1, D_MODEL), jnp.float32)
        b1 = jnp.zeros((1, DIM_FF), jnp.float32)
        b2 = jnp.zeros((1, D_MODEL), jnp.float32)
        ln1w = jnp.ones((1, D_MODEL), jnp.float32)
        ln1b = jnp.zeros((1, D_MODEL), jnp.float32)
        ln2w = jnp.ones((1, D_MODEL), jnp.float32)
        ln2b = jnp.zeros((1, D_MODEL), jnp.float32)
        layers.append((wq, wk, wv, bq, bk, bv, wo, bo,
                       w1, b1, w2, b2, ln1w, ln1b, ln2w, ln2b))
    # position embedding table, padding_idx=0 row is zero (as in nn.Embedding)
    pos_table = 0.1 * jax.random.normal(keys[-1], (MAX_LEN + 1, D_MODEL), jnp.float32)
    pos_table = pos_table.at[0].set(0.0)
    return layers, pos_table


def pack_params(raw_layers, pos_table):
    """Pack ALL parameters into two slabs (done once at init, outside jit):
         w_slab   (NUM_LAYERS*160, 96) bf16 : w_qkv | wo | w1 | w2 per layer
         misc_slab(MAX_LEN + 8*L, 96) f32  : pos_table[1:]; per-layer biases + LN."""
    w_rows = []
    misc_rows = [jnp.pad(pos_table[1:MAX_LEN + 1], ((0, 0), (0, W_LANES - D_MODEL)))]
    for p in raw_layers:
        wq, wk, wv, bq, bk, bv, wo, bo, w1, b1, w2, b2, ln1w, ln1b, ln2w, ln2b = p
        w_rows.append(jnp.concatenate([wq, wk, wv], axis=1))                   # (32, 96)
        w_rows.append(jnp.pad(wo, ((0, 0), (0, W_LANES - D_MODEL))))           # (32, 96)
        w_rows.append(jnp.pad(w1, ((0, 0), (0, W_LANES - DIM_FF))))            # (32, 96)
        w_rows.append(jnp.pad(w2, ((0, 0), (0, W_LANES - D_MODEL))))           # (64, 96)
        vec = jnp.zeros((VEC_ROWS, W_LANES), jnp.float32)
        vec = vec.at[0, :].set(jnp.concatenate([bq[0], bk[0], bv[0]]))
        vec = vec.at[1, :D_MODEL].set(bo[0])
        vec = vec.at[2, :DIM_FF].set(b1[0])
        vec = vec.at[3, :D_MODEL].set(b2[0])
        vec = vec.at[4, :D_MODEL].set(ln1w[0])
        vec = vec.at[5, :D_MODEL].set(ln1b[0])
        vec = vec.at[6, :D_MODEL].set(ln2w[0])
        vec = vec.at[7, :D_MODEL].set(ln2b[0])
        misc_rows.append(vec)
    w_slab = jnp.concatenate(w_rows, axis=0).astype(jnp.bfloat16)
    misc_slab = jnp.concatenate(misc_rows, axis=0).astype(jnp.float32)
    return w_slab, misc_slab


# ---- pure-JAX reference for sanity check --------------------------------------
def _ref_layer(x, mask, p):
    wq, wk, wv, bq, bk, bv, wo, bo, w1, b1, w2, b2, ln1w, ln1b, ln2w, ln2b = p
    B, S, D = x.shape
    q = (x @ wq + bq).reshape(B, S, NHEAD, HEAD_DIM).transpose(0, 2, 1, 3)
    k = (x @ wk + bk).reshape(B, S, NHEAD, HEAD_DIM).transpose(0, 2, 1, 3)
    v = (x @ wv + bv).reshape(B, S, NHEAD, HEAD_DIM).transpose(0, 2, 1, 3)
    s = jnp.einsum('bhqd,bhkd->bhqk', q, k) / math.sqrt(HEAD_DIM)
    row = jnp.arange(S)[:, None]
    col = jnp.arange(S)[None, :]
    bias = jnp.where((col > row)[None, None] | mask[:, None, None, :], -1e9, 0.0)
    p_attn = jax.nn.softmax(s + bias, axis=-1)
    o = jnp.einsum('bhqk,bhkd->bhqd', p_attn, v).transpose(0, 2, 1, 3).reshape(B, S, D)
    attn = o @ wo + bo
    y = x + attn
    mu = y.mean(-1, keepdims=True)
    y = (y - mu) * jax.lax.rsqrt(((y - mu) ** 2).mean(-1, keepdims=True) + LN_EPS) * ln1w + ln1b
    ff = jnp.maximum(y @ w1 + b1, 0.0) @ w2 + b2
    z = y + ff
    mu2 = z.mean(-1, keepdims=True)
    return (z - mu2) * jax.lax.rsqrt(((z - mu2) ** 2).mean(-1, keepdims=True) + LN_EPS) * ln2w + ln2b


def _ref_forward(x, mask, layer_params, pos_table):
    B, S, D = x.shape
    positions = jnp.broadcast_to(jnp.arange(1, S + 1, dtype=jnp.int32)[None, :], (B, S))
    positions = jnp.where(mask, 0, positions)
    h = x + jnp.take(pos_table, positions, axis=0)
    for p in layer_params:
        h = _ref_layer(h, mask, p)
    return h


if __name__ == "__main__":
    key = jax.random.PRNGKey(0)
    kp, kx = jax.random.split(key)
    raw_layers, pos_table = init_params(kp)
    w_slab, misc_slab = pack_params(raw_layers, pos_table)

    x = jax.random.normal(kx, (BATCH, SEQ, D_MODEL), jnp.float32)
    lengths = jnp.array([SEQ, 5], dtype=jnp.int32)
    mask = jnp.arange(SEQ)[None, :] >= lengths[:, None]      # True = padded position

    fwd = jax.jit(item_based_attention_block)
    out = fwd(x, mask, w_slab, misc_slab)
    out = jax.block_until_ready(out)

    ref = _ref_forward(x, mask, raw_layers, pos_table)       # pure f32 reference
    assert out.shape == (BATCH, SEQ, D_MODEL)
    assert not bool(jnp.any(jnp.isnan(out)))
    max_diff = float(jnp.max(jnp.abs(out - ref)))
    # Tolerance dominated by bf16 MXU operands (f32 accumulation); softmax now uses
    # row-max subtraction + exact divide, so no approx-reciprocal error remains.
    assert max_diff < 3e-2, f"mismatch vs reference: {max_diff}"

    print("KERNEL_OK")
</pallas_src>

<mosaic_0001>
module attributes {stable_mosaic.version = 11 : i64} {
  func.func @fused_block_kernel(%arg0: memref<16x32xf32, #tpu.memory_space<vmem>>, %arg1: memref<1x16xf32, #tpu.memory_space<vmem>>, %arg2: memref<320x96xbf16, #tpu.memory_space<vmem>>, %arg3: memref<32x96xf32, #tpu.memory_space<vmem>>, %arg4: memref<16x32xf32, #tpu.memory_space<vmem>>) attributes {dimension_semantics = [], scalar_prefetch = 0 : i64, scratch_operands = 0 : i64, tpu.core_type = #tpu.core_type<tc>} {
    %c0 = arith.constant 0 : index
    %c0_0 = arith.constant 0 : index
    %0 = vector.load %arg1[%c0, %c0_0] : memref<1x16xf32, #tpu.memory_space<vmem>>, vector<1x16xf32>
    %1 = tpu.iota {dimensions = array<i32: 0>} : vector<16x16xi32>
    %2 = tpu.iota {dimensions = array<i32: 1>} : vector<16x16xi32>
    %3 = arith.sitofp %1 : vector<16x16xi32> to vector<16x16xf32>
    %cst = arith.constant 1.250000e-01 : f32
    %4 = vector.broadcast %cst : f32 to vector<16x16xf32>
    %5 = arith.mulf %3, %4 : vector<16x16xf32>
    %6 = math.floor %5 : vector<16x16xf32>
    %7 = arith.sitofp %2 : vector<16x16xi32> to vector<16x16xf32>
    %cst_1 = arith.constant 1.250000e-01 : f32
    %8 = vector.broadcast %cst_1 : f32 to vector<16x16xf32>
    %9 = arith.mulf %7, %8 : vector<16x16xf32>
    %10 = math.floor %9 : vector<16x16xf32>
    %cst_2 = arith.constant 0.000000e+00 : f32
    %11 = vector.broadcast %cst_2 : f32 to vector<1x16xf32>
    %12 = arith.cmpf oeq, %0, %11 : vector<1x16xf32>
    %13 = vector.shape_cast %12 : vector<1x16xi1> to vector<1x16xi1>
    %14 = vector.broadcast %13 : vector<1x16xi1> to vector<16x16xi1>
    %15 = arith.cmpf oeq, %6, %10 : vector<16x16xf32>
    %16 = arith.cmpi sle, %2, %1 : vector<16x16xi32>
    %17 = arith.andi %15, %16 : vector<16x16xi1>
    %18 = arith.andi %17, %14 : vector<16x16xi1>
    %cst_3 = arith.constant 0.000000e+00 : f32
    %cst_4 = arith.constant -1.000000e+09 : f32
    %19 = vector.broadcast %cst_3 : f32 to vector<16x16xf32>
    %20 = vector.broadcast %cst_4 : f32 to vector<16x16xf32>
    %21 = arith.select %18, %19, %20 : vector<16x16xi1>, vector<16x16xf32>
    %22 = arith.cmpi eq, %1, %2 : vector<16x16xi32>
    %23 = vector.shape_cast %0 : vector<1x16xf32> to vector<1x16xf32>
    %24 = vector.broadcast %23 : vector<1x16xf32> to vector<16x16xf32>
    %cst_5 = arith.constant 0.000000e+00 : f32
    %25 = vector.broadcast %cst_5 : f32 to vector<16x16xf32>
    %26 = arith.select %22, %24, %25 : vector<16x16xi1>, vector<16x16xf32>
    %cst_6 = arith.constant dense<0.000000e+00> : vector<16xf32>
    %27 = vector.multi_reduction <add>, %26, %cst_6 [1] : vector<16x16xf32> to vector<16xf32>
    %28 = vector.shape_cast %27 : vector<16xf32> to vector<16x1xf32>
    %c0_7 = arith.constant 0 : index
    %c0_8 = arith.constant 0 : index
    %29 = vector.load %arg3[%c0_7, %c0_8] : memref<32x96xf32, #tpu.memory_space<vmem>>, vector<8x32xf32>
    %30 = tpu.concatenate %29, %29 in 0 : vector<8x32xf32>, vector<8x32xf32> -> vector<16x32xf32>
    %c0_9 = arith.constant 0 : index
    %c0_10 = arith.constant 0 : index
    %31 = vector.load %arg0[%c0_9, %c0_10] : memref<16x32xf32, #tpu.memory_space<vmem>>, vector<16x32xf32>
    %cst_11 = arith.constant 1.000000e+00 : f32
    %32 = vector.broadcast %cst_11 : f32 to vector<16x1xf32>
    %33 = arith.subf %32, %28 : vector<16x1xf32>
    %34 = vector.broadcast %33 : vector<16x1xf32> to vector<16x32xf32>
    %35 = arith.mulf %30, %34 : vector<16x32xf32>
    %36 = arith.addf %31, %35 : vector<16x32xf32>
    %c0_12 = arith.constant 0 : index
    %c0_13 = arith.constant 0 : index
    %37 = vector.load %arg2[%c0_12, %c0_13] : memref<320x96xbf16, #tpu.memory_space<vmem>>, vector<32x96xbf16>
    %c32 = arith.constant 32 : index
    %c0_14 = arith.constant 0 : index
    %38 = vector.load %arg2[%c32, %c0_14] : memref<320x96xbf16, #tpu.memory_space<vmem>>, vector<32x32xbf16>
    %c64 = arith.constant 64 : index
    %c0_15 = arith.constant 0 : index
    %39 = vector.load %arg2[%c64, %c0_15] : memref<320x96xbf16, #tpu.memory_space<vmem>>, vector<32x64xbf16>
    %c96 = arith.constant 96 : index
    %c0_16 = arith.constant 0 : index
    %40 = vector.load %arg2[%c96, %c0_16] : memref<320x96xbf16, #tpu.memory_space<vmem>>, vector<64x32xbf16>
    %c16 = arith.constant 16 : index
    %c0_17 = arith.constant 0 : index
    %41 = vector.load %arg3[%c16, %c0_17] : memref<32x96xf32, #tpu.memory_space<vmem>>, vector<8x96xf32>
    %42 = vector.extract_strided_slice %41 {offsets = [0, 0], sizes = [1, 96], strides = [1, 1]} : vector<8x96xf32> to vector<1x96xf32>
    %43 = vector.extract_strided_slice %41 {offsets = [1, 0], sizes = [1, 32], strides = [1, 1]} : vector<8x96xf32> to vector<1x32xf32>
    %44 = vector.extract_strided_slice %41 {offsets = [2, 0], sizes = [1, 64], strides = [1, 1]} : vector<8x96xf32> to vector<1x64xf32>
    %45 = vector.extract_strided_slice %41 {offsets = [3, 0], sizes = [1, 32], strides = [1, 1]} : vector<8x96xf32> to vector<1x32xf32>
    %46 = vector.extract_strided_slice %41 {offsets = [4, 0], sizes = [1, 32], strides = [1, 1]} : vector<8x96xf32> to vector<1x32xf32>
    %47 = vector.extract_strided_slice %41 {offsets = [5, 0], sizes = [1, 32], strides = [1, 1]} : vector<8x96xf32> to vector<1x32xf32>
    %48 = vector.extract_strided_slice %41 {offsets = [6, 0], sizes = [1, 32], strides = [1, 1]} : vector<8x96xf32> to vector<1x32xf32>
    %49 = vector.extract_strided_slice %41 {offsets = [7, 0], sizes = [1, 32], strides = [1, 1]} : vector<8x96xf32> to vector<1x32xf32>
    %50 = arith.truncf %36 : vector<16x32xf32> to vector<16x32xbf16>
    %cst_18 = arith.constant dense<0.000000e+00> : vector<16x96xf32>
    %51 = tpu.matmul %50, %37, %cst_18 {dimension_numbers = #tpu.dot_dimension_numbers<[1], [0], [0], [1], [0, 0, 1, 1], [], []>} : vector<16x32xbf16>, vector<32x96xbf16>, vector<16x96xf32> -> vector<16x96xf32>
    %52 = vector.broadcast %42 : vector<1x96xf32> to vector<16x96xf32>
    %53 = arith.addf %51, %52 : vector<16x96xf32>
    %54 = vector.extract_strided_slice %53 {offsets = [0, 0], sizes = [16, 32], strides = [1, 1]} : vector<16x96xf32> to vector<16x32xf32>
    %55 = arith.truncf %54 : vector<16x32xf32> to vector<16x32xbf16>
    %56 = vector.extract_strided_slice %53 {offsets = [0, 64], sizes = [16, 32], strides = [1, 1]} : vector<16x96xf32> to vector<16x32xf32>
    %57 = arith.truncf %56 : vector<16x32xf32> to vector<16x32xbf16>
    %58 = vector.extract_strided_slice %53 {offsets = [0, 32], sizes = [16, 32], strides = [1, 1]} : vector<16x96xf32> to vector<16x32xf32>
    %59 = tpu.transpose %58, [1, 0] : vector<16x32xf32> -> vector<32x16xf32>
    %60 = arith.truncf %59 : vector<32x16xf32> to vector<32x16xbf16>
    %cst_19 = arith.constant 0.000000e+00 : f32
    %61 = vector.broadcast %cst_19 : f32 to vector<16x32xf32>
    %62 = vector.extract_strided_slice %55 {offsets = [0, 0], sizes = [16, 8], strides = [1, 1]} : vector<16x32xbf16> to vector<16x8xbf16>
    %63 = vector.extract_strided_slice %60 {offsets = [0, 0], sizes = [8, 16], strides = [1, 1]} : vector<32x16xbf16> to vector<8x16xbf16>
    %cst_20 = arith.constant dense<0.000000e+00> : vector<16x16xf32>
    %64 = tpu.matmul %62, %63, %cst_20 {dimension_numbers = #tpu.dot_dimension_numbers<[1], [0], [0], [1], [0, 0, 1, 1], [], []>} : vector<16x8xbf16>, vector<8x16xbf16>, vector<16x16xf32> -> vector<16x16xf32>
    %cst_21 = arith.constant 0.353553385 : f32
    %65 = vector.broadcast %cst_21 : f32 to vector<16x16xf32>
    %66 = arith.mulf %64, %65 : vector<16x16xf32>
    %67 = arith.addf %66, %21 : vector<16x16xf32>
    %cst_22 = arith.constant dense<0xFF800000> : vector<16xf32>
    %68 = vector.multi_reduction <maximumf>, %67, %cst_22 [1] : vector<16x16xf32> to vector<16xf32>
    %69 = vector.shape_cast %68 : vector<16xf32> to vector<16x1xf32>
    %70 = vector.broadcast %69 : vector<16x1xf32> to vector<16x16xf32>
    %71 = arith.subf %67, %70 : vector<16x16xf32>
    %72 = math.exp %71 : vector<16x16xf32>
    %cst_23 = arith.constant dense<0.000000e+00> : vector<16xf32>
    %73 = vector.multi_reduction <add>, %72, %cst_23 [1] : vector<16x16xf32> to vector<16xf32>
    %74 = vector.shape_cast %73 : vector<16xf32> to vector<16x1xf32>
    %75 = vector.broadcast %74 : vector<16x1xf32> to vector<16x16xf32>
    %76 = arith.divf %72, %75 : vector<16x16xf32>
    %77 = arith.truncf %76 : vector<16x16xf32> to vector<16x16xbf16>
    %78 = vector.extract_strided_slice %57 {offsets = [0, 0], sizes = [16, 8], strides = [1, 1]} : vector<16x32xbf16> to vector<16x8xbf16>
    %cst_24 = arith.constant dense<0.000000e+00> : vector<16x8xf32>
    %79 = tpu.matmul %77, %78, %cst_24 {dimension_numbers = #tpu.dot_dimension_numbers<[1], [0], [0], [1], [0, 0, 1, 1], [], []>} : vector<16x16xbf16>, vector<16x8xbf16>, vector<16x8xf32> -> vector<16x8xf32>
    %80 = arith.truncf %79 : vector<16x8xf32> to vector<16x8xbf16>
    %81 = vector.extract_strided_slice %38 {offsets = [0, 0], sizes = [8, 32], strides = [1, 1]} : vector<32x32xbf16> to vector<8x32xbf16>
    %cst_25 = arith.constant dense<0.000000e+00> : vector<16x32xf32>
    %82 = tpu.matmul %80, %81, %cst_25 {dimension_numbers = #tpu.dot_dimension_numbers<[1], [0], [0], [1], [0, 0, 1, 1], [], []>} : vector<16x8xbf16>, vector<8x32xbf16>, vector<16x32xf32> -> vector<16x32xf32>
    %83 = arith.addf %61, %82 : vector<16x32xf32>
    %84 = vector.extract_strided_slice %55 {offsets = [0, 8], sizes = [16, 8], strides = [1, 1]} : vector<16x32xbf16> to vector<16x8xbf16>
    %85 = vector.extract_strided_slice %60 {offsets = [8, 0], sizes = [8, 16], strides = [1, 1]} : vector<32x16xbf16> to vector<8x16xbf16>
    %cst_26 = arith.constant dense<0.000000e+00> : vector<16x16xf32>
    %86 = tpu.matmul %84, %85, %cst_26 {dimension_numbers = #tpu.dot_dimension_numbers<[1], [0], [0], [1], [0, 0, 1, 1], [], []>} : vector<16x8xbf16>, vector<8x16xbf16>, vector<16x16xf32> -> vector<16x16xf32>
    %cst_27 = arith.constant 0.353553385 : f32
    %87 = vector.broadcast %cst_27 : f32 to vector<16x16xf32>
    %88 = arith.mulf %86, %87 : vector<16x16xf32>
    %89 = arith.addf %88, %21 : vector<16x16xf32>
    %cst_28 = arith.constant dense<0xFF800000> : vector<16xf32>
    %90 = vector.multi_reduction <maximumf>, %89, %cst_28 [1] : vector<16x16xf32> to vector<16xf32>
    %91 = vector.shape_cast %90 : vector<16xf32> to vector<16x1xf32>
    %92 = vector.broadcast %91 : vector<16x1xf32> to vector<16x16xf32>
    %93 = arith.subf %89, %92 : vector<16x16xf32>
    %94 = math.exp %93 : vector<16x16xf32>
    %cst_29 = arith.constant dense<0.000000e+00> : vector<16xf32>
    %95 = vector.multi_reduction <add>, %94, %cst_29 [1] : vector<16x16xf32> to vector<16xf32>
    %96 = vector.shape_cast %95 : vector<16xf32> to vector<16x1xf32>
    %97 = vector.broadcast %96 : vector<16x1xf32> to vector<16x16xf32>
    %98 = arith.divf %94, %97 : vector<16x16xf32>
    %99 = arith.truncf %98 : vector<16x16xf32> to vector<16x16xbf16>
    %100 = vector.extract_strided_slice %57 {offsets = [0, 8], sizes = [16, 8], strides = [1, 1]} : vector<16x32xbf16> to vector<16x8xbf16>
    %cst_30 = arith.constant dense<0.000000e+00> : vector<16x8xf32>
    %101 = tpu.matmul %99, %100, %cst_30 {dimension_numbers = #tpu.dot_dimension_numbers<[1], [0], [0], [1], [0, 0, 1, 1], [], []>} : vector<16x16xbf16>, vector<16x8xbf16>, vector<16x8xf32> -> vector<16x8xf32>
    %102 = arith.truncf %101 : vector<16x8xf32> to vector<16x8xbf16>
    %103 = vector.extract_strided_slice %38 {offsets = [8, 0], sizes = [8, 32], strides = [1, 1]} : vector<32x32xbf16> to vector<8x32xbf16>
    %cst_31 = arith.constant dense<0.000000e+00> : vector<16x32xf32>
    %104 = tpu.matmul %102, %103, %cst_31 {dimension_numbers = #tpu.dot_dimension_numbers<[1], [0], [0], [1], [0, 0, 1, 1], [], []>} : vector<16x8xbf16>, vector<8x32xbf16>, vector<16x32xf32> -> vector<16x32xf32>
    %105 = arith.addf %83, %104 : vector<16x32xf32>
    %106 = vector.extract_strided_slice %55 {offsets = [0, 16], sizes = [16, 8], strides = [1, 1]} : vector<16x32xbf16> to vector<16x8xbf16>
    %107 = vector.extract_strided_slice %60 {offsets = [16, 0], sizes = [8, 16], strides = [1, 1]} : vector<32x16xbf16> to vector<8x16xbf16>
    %cst_32 = arith.constant dense<0.000000e+00> : vector<16x16xf32>
    %108 = tpu.matmul %106, %107, %cst_32 {dimension_numbers = #tpu.dot_dimension_numbers<[1], [0], [0], [1], [0, 0, 1, 1], [], []>} : vector<16x8xbf16>, vector<8x16xbf16>, vector<16x16xf32> -> vector<16x16xf32>
    %cst_33 = arith.constant 0.353553385 : f32
    %109 = vector.broadcast %cst_33 : f32 to vector<16x16xf32>
    %110 = arith.mulf %108, %109 : vector<16x16xf32>
    %111 = arith.addf %110, %21 : vector<16x16xf32>
    %cst_34 = arith.constant dense<0xFF800000> : vector<16xf32>
    %112 = vector.multi_reduction <maximumf>, %111, %cst_34 [1] : vector<16x16xf32> to vector<16xf32>
    %113 = vector.shape_cast %112 : vector<16xf32> to vector<16x1xf32>
    %114 = vector.broadcast %113 : vector<16x1xf32> to vector<16x16xf32>
    %115 = arith.subf %111, %114 : vector<16x16xf32>
    %116 = math.exp %115 : vector<16x16xf32>
    %cst_35 = arith.constant dense<0.000000e+00> : vector<16xf32>
    %117 = vector.multi_reduction <add>, %116, %cst_35 [1] : vector<16x16xf32> to vector<16xf32>
    %118 = vector.shape_cast %117 : vector<16xf32> to vector<16x1xf32>
    %119 = vector.broadcast %118 : vector<16x1xf32> to vector<16x16xf32>
    %120 = arith.divf %116, %119 : vector<16x16xf32>
    %121 = arith.truncf %120 : vector<16x16xf32> to vector<16x16xbf16>
    %122 = vector.extract_strided_slice %57 {offsets = [0, 16], sizes = [16, 8], strides = [1, 1]} : vector<16x32xbf16> to vector<16x8xbf16>
    %cst_36 = arith.constant dense<0.000000e+00> : vector<16x8xf32>
    %123 = tpu.matmul %121, %122, %cst_36 {dimension_numbers = #tpu.dot_dimension_numbers<[1], [0], [0], [1], [0, 0, 1, 1], [], []>} : vector<16x16xbf16>, vector<16x8xbf16>, vector<16x8xf32> -> vector<16x8xf32>
    %124 = arith.truncf %123 : vector<16x8xf32> to vector<16x8xbf16>
    %125 = vector.extract_strided_slice %38 {offsets = [16, 0], sizes = [8, 32], strides = [1, 1]} : vector<32x32xbf16> to vector<8x32xbf16>
    %cst_37 = arith.constant dense<0.000000e+00> : vector<16x32xf32>
    %126 = tpu.matmul %124, %125, %cst_37 {dimension_numbers = #tpu.dot_dimension_numbers<[1], [0], [0], [1], [0, 0, 1, 1], [], []>} : vector<16x8xbf16>, vector<8x32xbf16>, vector<16x32xf32> -> vector<16x32xf32>
    %127 = arith.addf %105, %126 : vector<16x32xf32>
    %128 = vector.extract_strided_slice %55 {offsets = [0, 24], sizes = [16, 8], strides = [1, 1]} : vector<16x32xbf16> to vector<16x8xbf16>
    %129 = vector.extract_strided_slice %60 {offsets = [24, 0], sizes = [8, 16], strides = [1, 1]} : vector<32x16xbf16> to vector<8x16xbf16>
    %cst_38 = arith.constant dense<0.000000e+00> : vector<16x16xf32>
    %130 = tpu.matmul %128, %129, %cst_38 {dimension_numbers = #tpu.dot_dimension_numbers<[1], [0], [0], [1], [0, 0, 1, 1], [], []>} : vector<16x8xbf16>, vector<8x16xbf16>, vector<16x16xf32> -> vector<16x16xf32>
    %cst_39 = arith.constant 0.353553385 : f32
    %131 = vector.broadcast %cst_39 : f32 to vector<16x16xf32>
    %132 = arith.mulf %130, %131 : vector<16x16xf32>
    %133 = arith.addf %132, %21 : vector<16x16xf32>
    %cst_40 = arith.constant dense<0xFF800000> : vector<16xf32>
    %134 = vector.multi_reduction <maximumf>, %133, %cst_40 [1] : vector<16x16xf32> to vector<16xf32>
    %135 = vector.shape_cast %134 : vector<16xf32> to vector<16x1xf32>
    %136 = vector.broadcast %135 : vector<16x1xf32> to vector<16x16xf32>
    %137 = arith.subf %133, %136 : vector<16x16xf32>
    %138 = math.exp %137 : vector<16x16xf32>
    %cst_41 = arith.constant dense<0.000000e+00> : vector<16xf32>
    %139 = vector.multi_reduction <add>, %138, %cst_41 [1] : vector<16x16xf32> to vector<16xf32>
    %140 = vector.shape_cast %139 : vector<16xf32> to vector<16x1xf32>
    %141 = vector.broadcast %140 : vector<16x1xf32> to vector<16x16xf32>
    %142 = arith.divf %138, %141 : vector<16x16xf32>
    %143 = arith.truncf %142 : vector<16x16xf32> to vector<16x16xbf16>
    %144 = vector.extract_strided_slice %57 {offsets = [0, 24], sizes = [16, 8], strides = [1, 1]} : vector<16x32xbf16> to vector<16x8xbf16>
    %cst_42 = arith.constant dense<0.000000e+00> : vector<16x8xf32>
    %145 = tpu.matmul %143, %144, %cst_42 {dimension_numbers = #tpu.dot_dimension_numbers<[1], [0], [0], [1], [0, 0, 1, 1], [], []>} : vector<16x16xbf16>, vector<16x8xbf16>, vector<16x8xf32> -> vector<16x8xf32>
    %146 = arith.truncf %145 : vector<16x8xf32> to vector<16x8xbf16>
    %147 = vector.extract_strided_slice %38 {offsets = [24, 0], sizes = [8, 32], strides = [1, 1]} : vector<32x32xbf16> to vector<8x32xbf16>
    %cst_43 = arith.constant dense<0.000000e+00> : vector<16x32xf32>
    %148 = tpu.matmul %146, %147, %cst_43 {dimension_numbers = #tpu.dot_dimension_numbers<[1], [0], [0], [1], [0, 0, 1, 1], [], []>} : vector<16x8xbf16>, vector<8x32xbf16>, vector<16x32xf32> -> vector<16x32xf32>
    %149 = arith.addf %127, %148 : vector<16x32xf32>
    %150 = arith.addf %36, %149 : vector<16x32xf32>
    %151 = vector.broadcast %43 : vector<1x32xf32> to vector<16x32xf32>
    %152 = arith.addf %150, %151 : vector<16x32xf32>
    %cst_44 = arith.constant dense<0.000000e+00> : vector<16xf32>
    %153 = vector.multi_reduction <add>, %152, %cst_44 [1] : vector<16x32xf32> to vector<16xf32>
    %154 = vector.shape_cast %153 : vector<16xf32> to vector<16x1xf32>
    %cst_45 = arith.constant 3.200000e+01 : f32
    %155 = vector.broadcast %cst_45 : f32 to vector<16x1xf32>
    %156 = arith.divf %154, %155 : vector<16x1xf32>
    %157 = vector.broadcast %156 : vector<16x1xf32> to vector<16x32xf32>
    %158 = arith.subf %152, %157 : vector<16x32xf32>
    %159 = arith.mulf %158, %158 : vector<16x32xf32>
    %cst_46 = arith.constant dense<0.000000e+00> : vector<16xf32>
    %160 = vector.multi_reduction <add>, %159, %cst_46 [1] : vector<16x32xf32> to vector<16xf32>
    %161 = vector.shape_cast %160 : vector<16xf32> to vector<16x1xf32>
    %cst_47 = arith.constant 3.200000e+01 : f32
    %162 = vector.broadcast %cst_47 : f32 to vector<16x1xf32>
    %163 = arith.divf %161, %162 : vector<16x1xf32>
    %164 = vector.broadcast %156 : vector<16x1xf32> to vector<16x32xf32>
    %165 = arith.subf %152, %164 : vector<16x32xf32>
    %cst_48 = arith.constant 9.99999974E-6 : f32
    %166 = vector.broadcast %cst_48 : f32 to vector<16x1xf32>
    %167 = arith.addf %163, %166 : vector<16x1xf32>
    %168 = math.rsqrt %167 : vector<16x1xf32>
    %169 = vector.broadcast %168 : vector<16x1xf32> to vector<16x32xf32>
    %170 = arith.mulf %165, %169 : vector<16x32xf32>
    %171 = vector.broadcast %46 : vector<1x32xf32> to vector<16x32xf32>
    %172 = arith.mulf %170, %171 : vector<16x32xf32>
    %173 = vector.broadcast %47 : vector<1x32xf32> to vector<16x32xf32>
    %174 = arith.addf %172, %173 : vector<16x32xf32>
    %175 = arith.truncf %174 : vector<16x32xf32> to vector<16x32xbf16>
    %cst_49 = arith.constant dense<0.000000e+00> : vector<16x64xf32>
    %176 = tpu.matmul %175, %39, %cst_49 {dimension_numbers = #tpu.dot_dimension_numbers<[1], [0], [0], [1], [0, 0, 1, 1], [], []>} : vector<16x32xbf16>, vector<32x64xbf16>, vector<16x64xf32> -> vector<16x64xf32>
    %177 = vector.broadcast %44 : vector<1x64xf32> to vector<16x64xf32>
    %178 = arith.addf %176, %177 : vector<16x64xf32>
    %cst_50 = arith.constant 0.000000e+00 : f32
    %179 = vector.broadcast %cst_50 : f32 to vector<16x64xf32>
    %180 = arith.maximumf %178, %179 : vector<16x64xf32>
    %181 = arith.truncf %180 : vector<16x64xf32> to vector<16x64xbf16>
    %cst_51 = arith.constant dense<0.000000e+00> : vector<16x32xf32>
    %182 = tpu.matmul %181, %40, %cst_51 {dimension_numbers = #tpu.dot_dimension_numbers<[1], [0], [0], [1], [0, 0, 1, 1], [], []>} : vector<16x64xbf16>, vector<64x32xbf16>, vector<16x32xf32> -> vector<16x32xf32>
    %183 = vector.broadcast %45 : vector<1x32xf32> to vector<16x32xf32>
    %184 = arith.addf %182, %183 : vector<16x32xf32>
    %185 = arith.addf %174, %184 : vector<16x32xf32>
    %cst_52 = arith.constant dense<0.000000e+00> : vector<16xf32>
    %186 = vector.multi_reduction <add>, %185, %cst_52 [1] : vector<16x32xf32> to vector<16xf32>
    %187 = vector.shape_cast %186 : vector<16xf32> to vector<16x1xf32>
    %cst_53 = arith.constant 3.200000e+01 : f32
    %188 = vector.broadcast %cst_53 : f32 to vector<16x1xf32>
    %189 = arith.divf %187, %188 : vector<16x1xf32>
    %190 = vector.broadcast %189 : vector<16x1xf32> to vector<16x32xf32>
    %191 = arith.subf %185, %190 : vector<16x32xf32>
    %192 = arith.mulf %191, %191 : vector<16x32xf32>
    %cst_54 = arith.constant dense<0.000000e+00> : vector<16xf32>
    %193 = vector.multi_reduction <add>, %192, %cst_54 [1] : vector<16x32xf32> to vector<16xf32>
    %194 = vector.shape_cast %193 : vector<16xf32> to vector<16x1xf32>
    %cst_55 = arith.constant 3.200000e+01 : f32
    %195 = vector.broadcast %cst_55 : f32 to vector<16x1xf32>
    %196 = arith.divf %194, %195 : vector<16x1xf32>
    %197 = vector.broadcast %189 : vector<16x1xf32> to vector<16x32xf32>
    %198 = arith.subf %185, %197 : vector<16x32xf32>
    %cst_56 = arith.constant 9.99999974E-6 : f32
    %199 = vector.broadcast %cst_56 : f32 to vector<16x1xf32>
    %200 = arith.addf %196, %199 : vector<16x1xf32>
    %201 = math.rsqrt %200 : vector<16x1xf32>
    %202 = vector.broadcast %201 : vector<16x1xf32> to vector<16x32xf32>
    %203 = arith.mulf %198, %202 : vector<16x32xf32>
    %204 = vector.broadcast %48 : vector<1x32xf32> to vector<16x32xf32>
    %205 = arith.mulf %203, %204 : vector<16x32xf32>
    %206 = vector.broadcast %49 : vector<1x32xf32> to vector<16x32xf32>
    %207 = arith.addf %205, %206 : vector<16x32xf32>
    %c160 = arith.constant 160 : index
    %c0_57 = arith.constant 0 : index
    %208 = vector.load %arg2[%c160, %c0_57] : memref<320x96xbf16, #tpu.memory_space<vmem>>, vector<32x96xbf16>
    %c192 = arith.constant 192 : index
    %c0_58 = arith.constant 0 : index
    %209 = vector.load %arg2[%c192, %c0_58] : memref<320x96xbf16, #tpu.memory_space<vmem>>, vector<32x32xbf16>
    %c224 = arith.constant 224 : index
    %c0_59 = arith.constant 0 : index
    %210 = vector.load %arg2[%c224, %c0_59] : memref<320x96xbf16, #tpu.memory_space<vmem>>, vector<32x64xbf16>
    %c256 = arith.constant 256 : index
    %c0_60 = arith.constant 0 : index
    %211 = vector.load %arg2[%c256, %c0_60] : memref<320x96xbf16, #tpu.memory_space<vmem>>, vector<64x32xbf16>
    %c24 = arith.constant 24 : index
    %c0_61 = arith.constant 0 : index
    %212 = vector.load %arg3[%c24, %c0_61] : memref<32x96xf32, #tpu.memory_space<vmem>>, vector<8x96xf32>
    %213 = vector.extract_strided_slice %212 {offsets = [0, 0], sizes = [1, 96], strides = [1, 1]} : vector<8x96xf32> to vector<1x96xf32>
    %214 = vector.extract_strided_slice %212 {offsets = [1, 0], sizes = [1, 32], strides = [1, 1]} : vector<8x96xf32> to vector<1x32xf32>
    %215 = vector.extract_strided_slice %212 {offsets = [2, 0], sizes = [1, 64], strides = [1, 1]} : vector<8x96xf32> to vector<1x64xf32>
    %216 = vector.extract_strided_slice %212 {offsets = [3, 0], sizes = [1, 32], strides = [1, 1]} : vector<8x96xf32> to vector<1x32xf32>
    %217 = vector.extract_strided_slice %212 {offsets = [4, 0], sizes = [1, 32], strides = [1, 1]} : vector<8x96xf32> to vector<1x32xf32>
    %218 = vector.extract_strided_slice %212 {offsets = [5, 0], sizes = [1, 32], strides = [1, 1]} : vector<8x96xf32> to vector<1x32xf32>
    %219 = vector.extract_strided_slice %212 {offsets = [6, 0], sizes = [1, 32], strides = [1, 1]} : vector<8x96xf32> to vector<1x32xf32>
    %220 = vector.extract_strided_slice %212 {offsets = [7, 0], sizes = [1, 32], strides = [1, 1]} : vector<8x96xf32> to vector<1x32xf32>
    %221 = arith.truncf %207 : vector<16x32xf32> to vector<16x32xbf16>
    %cst_62 = arith.constant dense<0.000000e+00> : vector<16x96xf32>
    %222 = tpu.matmul %221, %208, %cst_62 {dimension_numbers = #tpu.dot_dimension_numbers<[1], [0], [0], [1], [0, 0, 1, 1], [], []>} : vector<16x32xbf16>, vector<32x96xbf16>, vector<16x96xf32> -> vector<16x96xf32>
    %223 = vector.broadcast %213 : vector<1x96xf32> to vector<16x96xf32>
    %224 = arith.addf %222, %223 : vector<16x96xf32>
    %225 = vector.extract_strided_slice %224 {offsets = [0, 0], sizes = [16, 32], strides = [1, 1]} : vector<16x96xf32> to vector<16x32xf32>
    %226 = arith.truncf %225 : vector<16x32xf32> to vector<16x32xbf16>
    %227 = vector.extract_strided_slice %224 {offsets = [0, 64], sizes = [16, 32], strides = [1, 1]} : vector<16x96xf32> to vector<16x32xf32>
    %228 = arith.truncf %227 : vector<16x32xf32> to vector<16x32xbf16>
    %229 = vector.extract_strided_slice %224 {offsets = [0, 32], sizes = [16, 32], strides = [1, 1]} : vector<16x96xf32> to vector<16x32xf32>
    %230 = tpu.transpose %229, [1, 0] : vector<16x32xf32> -> vector<32x16xf32>
    %231 = arith.truncf %230 : vector<32x16xf32> to vector<32x16xbf16>
    %cst_63 = arith.constant 0.000000e+00 : f32
    %232 = vector.broadcast %cst_63 : f32 to vector<16x32xf32>
    %233 = vector.extract_strided_slice %226 {offsets = [0, 0], sizes = [16, 8], strides = [1, 1]} : vector<16x32xbf16> to vector<16x8xbf16>
    %234 = vector.extract_strided_slice %231 {offsets = [0, 0], sizes = [8, 16], strides = [1, 1]} : vector<32x16xbf16> to vector<8x16xbf16>
    %cst_64 = arith.constant dense<0.000000e+00> : vector<16x16xf32>
    %235 = tpu.matmul %233, %234, %cst_64 {dimension_numbers = #tpu.dot_dimension_numbers<[1], [0], [0], [1], [0, 0, 1, 1], [], []>} : vector<16x8xbf16>, vector<8x16xbf16>, vector<16x16xf32> -> vector<16x16xf32>
    %cst_65 = arith.constant 0.353553385 : f32
    %236 = vector.broadcast %cst_65 : f32 to vector<16x16xf32>
    %237 = arith.mulf %235, %236 : vector<16x16xf32>
    %238 = arith.addf %237, %21 : vector<16x16xf32>
    %cst_66 = arith.constant dense<0xFF800000> : vector<16xf32>
    %239 = vector.multi_reduction <maximumf>, %238, %cst_66 [1] : vector<16x16xf32> to vector<16xf32>
    %240 = vector.shape_cast %239 : vector<16xf32> to vector<16x1xf32>
    %241 = vector.broadcast %240 : vector<16x1xf32> to vector<16x16xf32>
    %242 = arith.subf %238, %241 : vector<16x16xf32>
    %243 = math.exp %242 : vector<16x16xf32>
    %cst_67 = arith.constant dense<0.000000e+00> : vector<16xf32>
    %244 = vector.multi_reduction <add>, %243, %cst_67 [1] : vector<16x16xf32> to vector<16xf32>
    %245 = vector.shape_cast %244 : vector<16xf32> to vector<16x1xf32>
    %246 = vector.broadcast %245 : vector<16x1xf32> to vector<16x16xf32>
    %247 = arith.divf %243, %246 : vector<16x16xf32>
    %248 = arith.truncf %247 : vector<16x16xf32> to vector<16x16xbf16>
    %249 = vector.extract_strided_slice %228 {offsets = [0, 0], sizes = [16, 8], strides = [1, 1]} : vector<16x32xbf16> to vector<16x8xbf16>
    %cst_68 = arith.constant dense<0.000000e+00> : vector<16x8xf32>
    %250 = tpu.matmul %248, %249, %cst_68 {dimension_numbers = #tpu.dot_dimension_numbers<[1], [0], [0], [1], [0, 0, 1, 1], [], []>} : vector<16x16xbf16>, vector<16x8xbf16>, vector<16x8xf32> -> vector<16x8xf32>
    %251 = arith.truncf %250 : vector<16x8xf32> to vector<16x8xbf16>
    %252 = vector.extract_strided_slice %209 {offsets = [0, 0], sizes = [8, 32], strides = [1, 1]} : vector<32x32xbf16> to vector<8x32xbf16>
    %cst_69 = arith.constant dense<0.000000e+00> : vector<16x32xf32>
    %253 = tpu.matmul %251, %252, %cst_69 {dimension_numbers = #tpu.dot_dimension_numbers<[1], [0], [0], [1], [0, 0, 1, 1], [], []>} : vector<16x8xbf16>, vector<8x32xbf16>, vector<16x32xf32> -> vector<16x32xf32>
    %254 = arith.addf %232, %253 : vector<16x32xf32>
    %255 = vector.extract_strided_slice %226 {offsets = [0, 8], sizes = [16, 8], strides = [1, 1]} : vector<16x32xbf16> to vector<16x8xbf16>
    %256 = vector.extract_strided_slice %231 {offsets = [8, 0], sizes = [8, 16], strides = [1, 1]} : vector<32x16xbf16> to vector<8x16xbf16>
    %cst_70 = arith.constant dense<0.000000e+00> : vector<16x16xf32>
    %257 = tpu.matmul %255, %256, %cst_70 {dimension_numbers = #tpu.dot_dimension_numbers<[1], [0], [0], [1], [0, 0, 1, 1], [], []>} : vector<16x8xbf16>, vector<8x16xbf16>, vector<16x16xf32> -> vector<16x16xf32>
    %cst_71 = arith.constant 0.353553385 : f32
    %258 = vector.broadcast %cst_71 : f32 to vector<16x16xf32>
    %259 = arith.mulf %257, %258 : vector<16x16xf32>
    %260 = arith.addf %259, %21 : vector<16x16xf32>
    %cst_72 = arith.constant dense<0xFF800000> : vector<16xf32>
    %261 = vector.multi_reduction <maximumf>, %260, %cst_72 [1] : vector<16x16xf32> to vector<16xf32>
    %262 = vector.shape_cast %261 : vector<16xf32> to vector<16x1xf32>
    %263 = vector.broadcast %262 : vector<16x1xf32> to vector<16x16xf32>
    %264 = arith.subf %260, %263 : vector<16x16xf32>
    %265 = math.exp %264 : vector<16x16xf32>
    %cst_73 = arith.constant dense<0.000000e+00> : vector<16xf32>
    %266 = vector.multi_reduction <add>, %265, %cst_73 [1] : vector<16x16xf32> to vector<16xf32>
    %267 = vector.shape_cast %266 : vector<16xf32> to vector<16x1xf32>
    %268 = vector.broadcast %267 : vector<16x1xf32> to vector<16x16xf32>
    %269 = arith.divf %265, %268 : vector<16x16xf32>
    %270 = arith.truncf %269 : vector<16x16xf32> to vector<16x16xbf16>
    %271 = vector.extract_strided_slice %228 {offsets = [0, 8], sizes = [16, 8], strides = [1, 1]} : vector<16x32xbf16> to vector<16x8xbf16>
    %cst_74 = arith.constant dense<0.000000e+00> : vector<16x8xf32>
    %272 = tpu.matmul %270, %271, %cst_74 {dimension_numbers = #tpu.dot_dimension_numbers<[1], [0], [0], [1], [0, 0, 1, 1], [], []>} : vector<16x16xbf16>, vector<16x8xbf16>, vector<16x8xf32> -> vector<16x8xf32>
    %273 = arith.truncf %272 : vector<16x8xf32> to vector<16x8xbf16>
    %274 = vector.extract_strided_slice %209 {offsets = [8, 0], sizes = [8, 32], strides = [1, 1]} : vector<32x32xbf16> to vector<8x32xbf16>
    %cst_75 = arith.constant dense<0.000000e+00> : vector<16x32xf32>
    %275 = tpu.matmul %273, %274, %cst_75 {dimension_numbers = #tpu.dot_dimension_numbers<[1], [0], [0], [1], [0, 0, 1, 1], [], []>} : vector<16x8xbf16>, vector<8x32xbf16>, vector<16x32xf32> -> vector<16x32xf32>
    %276 = arith.addf %254, %275 : vector<16x32xf32>
    %277 = vector.extract_strided_slice %226 {offsets = [0, 16], sizes = [16, 8], strides = [1, 1]} : vector<16x32xbf16> to vector<16x8xbf16>
    %278 = vector.extract_strided_slice %231 {offsets = [16, 0], sizes = [8, 16], strides = [1, 1]} : vector<32x16xbf16> to vector<8x16xbf16>
    %cst_76 = arith.constant dense<0.000000e+00> : vector<16x16xf32>
    %279 = tpu.matmul %277, %278, %cst_76 {dimension_numbers = #tpu.dot_dimension_numbers<[1], [0], [0], [1], [0, 0, 1, 1], [], []>} : vector<16x8xbf16>, vector<8x16xbf16>, vector<16x16xf32> -> vector<16x16xf32>
    %cst_77 = arith.constant 0.353553385 : f32
    %280 = vector.broadcast %cst_77 : f32 to vector<16x16xf32>
    %281 = arith.mulf %279, %280 : vector<16x16xf32>
    %282 = arith.addf %281, %21 : vector<16x16xf32>
    %cst_78 = arith.constant dense<0xFF800000> : vector<16xf32>
    %283 = vector.multi_reduction <maximumf>, %282, %cst_78 [1] : vector<16x16xf32> to vector<16xf32>
    %284 = vector.shape_cast %283 : vector<16xf32> to vector<16x1xf32>
    %285 = vector.broadcast %284 : vector<16x1xf32> to vector<16x16xf32>
    %286 = arith.subf %282, %285 : vector<16x16xf32>
    %287 = math.exp %286 : vector<16x16xf32>
    %cst_79 = arith.constant dense<0.000000e+00> : vector<16xf32>
    %288 = vector.multi_reduction <add>, %287, %cst_79 [1] : vector<16x16xf32> to vector<16xf32>
    %289 = vector.shape_cast %288 : vector<16xf32> to vector<16x1xf32>
    %290 = vector.broadcast %289 : vector<16x1xf32> to vector<16x16xf32>
    %291 = arith.divf %287, %290 : vector<16x16xf32>
    %292 = arith.truncf %291 : vector<16x16xf32> to vector<16x16xbf16>
    %293 = vector.extract_strided_slice %228 {offsets = [0, 16], sizes = [16, 8], strides = [1, 1]} : vector<16x32xbf16> to vector<16x8xbf16>
    %cst_80 = arith.constant dense<0.000000e+00> : vector<16x8xf32>
    %294 = tpu.matmul %292, %293, %cst_80 {dimension_numbers = #tpu.dot_dimension_numbers<[1], [0], [0], [1], [0, 0, 1, 1], [], []>} : vector<16x16xbf16>, vector<16x8xbf16>, vector<16x8xf32> -> vector<16x8xf32>
    %295 = arith.truncf %294 : vector<16x8xf32> to vector<16x8xbf16>
    %296 = vector.extract_strided_slice %209 {offsets = [16, 0], sizes = [8, 32], strides = [1, 1]} : vector<32x32xbf16> to vector<8x32xbf16>
    %cst_81 = arith.constant dense<0.000000e+00> : vector<16x32xf32>
    %297 = tpu.matmul %295, %296, %cst_81 {dimension_numbers = #tpu.dot_dimension_numbers<[1], [0], [0], [1], [0, 0, 1, 1], [], []>} : vector<16x8xbf16>, vector<8x32xbf16>, vector<16x32xf32> -> vector<16x32xf32>
    %298 = arith.addf %276, %297 : vector<16x32xf32>
    %299 = vector.extract_strided_slice %226 {offsets = [0, 24], sizes = [16, 8], strides = [1, 1]} : vector<16x32xbf16> to vector<16x8xbf16>
    %300 = vector.extract_strided_slice %231 {offsets = [24, 0], sizes = [8, 16], strides = [1, 1]} : vector<32x16xbf16> to vector<8x16xbf16>
    %cst_82 = arith.constant dense<0.000000e+00> : vector<16x16xf32>
    %301 = tpu.matmul %299, %300, %cst_82 {dimension_numbers = #tpu.dot_dimension_numbers<[1], [0], [0], [1], [0, 0, 1, 1], [], []>} : vector<16x8xbf16>, vector<8x16xbf16>, vector<16x16xf32> -> vector<16x16xf32>
    %cst_83 = arith.constant 0.353553385 : f32
    %302 = vector.broadcast %cst_83 : f32 to vector<16x16xf32>
    %303 = arith.mulf %301, %302 : vector<16x16xf32>
    %304 = arith.addf %303, %21 : vector<16x16xf32>
    %cst_84 = arith.constant dense<0xFF800000> : vector<16xf32>
    %305 = vector.multi_reduction <maximumf>, %304, %cst_84 [1] : vector<16x16xf32> to vector<16xf32>
    %306 = vector.shape_cast %305 : vector<16xf32> to vector<16x1xf32>
    %307 = vector.broadcast %306 : vector<16x1xf32> to vector<16x16xf32>
    %308 = arith.subf %304, %307 : vector<16x16xf32>
    %309 = math.exp %308 : vector<16x16xf32>
    %cst_85 = arith.constant dense<0.000000e+00> : vector<16xf32>
    %310 = vector.multi_reduction <add>, %309, %cst_85 [1] : vector<16x16xf32> to vector<16xf32>
    %311 = vector.shape_cast %310 : vector<16xf32> to vector<16x1xf32>
    %312 = vector.broadcast %311 : vector<16x1xf32> to vector<16x16xf32>
    %313 = arith.divf %309, %312 : vector<16x16xf32>
    %314 = arith.truncf %313 : vector<16x16xf32> to vector<16x16xbf16>
    %315 = vector.extract_strided_slice %228 {offsets = [0, 24], sizes = [16, 8], strides = [1, 1]} : vector<16x32xbf16> to vector<16x8xbf16>
    %cst_86 = arith.constant dense<0.000000e+00> : vector<16x8xf32>
    %316 = tpu.matmul %314, %315, %cst_86 {dimension_numbers = #tpu.dot_dimension_numbers<[1], [0], [0], [1], [0, 0, 1, 1], [], []>} : vector<16x16xbf16>, vector<16x8xbf16>, vector<16x8xf32> -> vector<16x8xf32>
    %317 = arith.truncf %316 : vector<16x8xf32> to vector<16x8xbf16>
    %318 = vector.extract_strided_slice %209 {offsets = [24, 0], sizes = [8, 32], strides = [1, 1]} : vector<32x32xbf16> to vector<8x32xbf16>
    %cst_87 = arith.constant dense<0.000000e+00> : vector<16x32xf32>
    %319 = tpu.matmul %317, %318, %cst_87 {dimension_numbers = #tpu.dot_dimension_numbers<[1], [0], [0], [1], [0, 0, 1, 1], [], []>} : vector<16x8xbf16>, vector<8x32xbf16>, vector<16x32xf32> -> vector<16x32xf32>
    %320 = arith.addf %298, %319 : vector<16x32xf32>
    %321 = arith.addf %207, %320 : vector<16x32xf32>
    %322 = vector.broadcast %214 : vector<1x32xf32> to vector<16x32xf32>
    %323 = arith.addf %321, %322 : vector<16x32xf32>
    %cst_88 = arith.constant dense<0.000000e+00> : vector<16xf32>
    %324 = vector.multi_reduction <add>, %323, %cst_88 [1] : vector<16x32xf32> to vector<16xf32>
    %325 = vector.shape_cast %324 : vector<16xf32> to vector<16x1xf32>
    %cst_89 = arith.constant 3.200000e+01 : f32
    %326 = vector.broadcast %cst_89 : f32 to vector<16x1xf32>
    %327 = arith.divf %325, %326 : vector<16x1xf32>
    %328 = vector.broadcast %327 : vector<16x1xf32> to vector<16x32xf32>
    %329 = arith.subf %323, %328 : vector<16x32xf32>
    %330 = arith.mulf %329, %329 : vector<16x32xf32>
    %cst_90 = arith.constant dense<0.000000e+00> : vector<16xf32>
    %331 = vector.multi_reduction <add>, %330, %cst_90 [1] : vector<16x32xf32> to vector<16xf32>
    %332 = vector.shape_cast %331 : vector<16xf32> to vector<16x1xf32>
    %cst_91 = arith.constant 3.200000e+01 : f32
    %333 = vector.broadcast %cst_91 : f32 to vector<16x1xf32>
    %334 = arith.divf %332, %333 : vector<16x1xf32>
    %335 = vector.broadcast %327 : vector<16x1xf32> to vector<16x32xf32>
    %336 = arith.subf %323, %335 : vector<16x32xf32>
    %cst_92 = arith.constant 9.99999974E-6 : f32
    %337 = vector.broadcast %cst_92 : f32 to vector<16x1xf32>
    %338 = arith.addf %334, %337 : vector<16x1xf32>
    %339 = math.rsqrt %338 : vector<16x1xf32>
    %340 = vector.broadcast %339 : vector<16x1xf32> to vector<16x32xf32>
    %341 = arith.mulf %336, %340 : vector<16x32xf32>
    %342 = vector.broadcast %217 : vector<1x32xf32> to vector<16x32xf32>
    %343 = arith.mulf %341, %342 : vector<16x32xf32>
    %344 = vector.broadcast %218 : vector<1x32xf32> to vector<16x32xf32>
    %345 = arith.addf %343, %344 : vector<16x32xf32>
    %346 = arith.truncf %345 : vector<16x32xf32> to vector<16x32xbf16>
    %cst_93 = arith.constant dense<0.000000e+00> : vector<16x64xf32>
    %347 = tpu.matmul %346, %210, %cst_93 {dimension_numbers = #tpu.dot_dimension_numbers<[1], [0], [0], [1], [0, 0, 1, 1], [], []>} : vector<16x32xbf16>, vector<32x64xbf16>, vector<16x64xf32> -> vector<16x64xf32>
    %348 = vector.broadcast %215 : vector<1x64xf32> to vector<16x64xf32>
    %349 = arith.addf %347, %348 : vector<16x64xf32>
    %cst_94 = arith.constant 0.000000e+00 : f32
    %350 = vector.broadcast %cst_94 : f32 to vector<16x64xf32>
    %351 = arith.maximumf %349, %350 : vector<16x64xf32>
    %352 = arith.truncf %351 : vector<16x64xf32> to vector<16x64xbf16>
    %cst_95 = arith.constant dense<0.000000e+00> : vector<16x32xf32>
    %353 = tpu.matmul %352, %211, %cst_95 {dimension_numbers = #tpu.dot_dimension_numbers<[1], [0], [0], [1], [0, 0, 1, 1], [], []>} : vector<16x64xbf16>, vector<64x32xbf16>, vector<16x32xf32> -> vector<16x32xf32>
    %354 = vector.broadcast %216 : vector<1x32xf32> to vector<16x32xf32>
    %355 = arith.addf %353, %354 : vector<16x32xf32>
    %356 = arith.addf %345, %355 : vector<16x32xf32>
    %cst_96 = arith.constant dense<0.000000e+00> : vector<16xf32>
    %357 = vector.multi_reduction <add>, %356, %cst_96 [1] : vector<16x32xf32> to vector<16xf32>
    %358 = vector.shape_cast %357 : vector<16xf32> to vector<16x1xf32>
    %cst_97 = arith.constant 3.200000e+01 : f32
    %359 = vector.broadcast %cst_97 : f32 to vector<16x1xf32>
    %360 = arith.divf %358, %359 : vector<16x1xf32>
    %361 = vector.broadcast %360 : vector<16x1xf32> to vector<16x32xf32>
    %362 = arith.subf %356, %361 : vector<16x32xf32>
    %363 = arith.mulf %362, %362 : vector<16x32xf32>
    %cst_98 = arith.constant dense<0.000000e+00> : vector<16xf32>
    %364 = vector.multi_reduction <add>, %363, %cst_98 [1] : vector<16x32xf32> to vector<16xf32>
    %365 = vector.shape_cast %364 : vector<16xf32> to vector<16x1xf32>
    %cst_99 = arith.constant 3.200000e+01 : f32
    %366 = vector.broadcast %cst_99 : f32 to vector<16x1xf32>
    %367 = arith.divf %365, %366 : vector<16x1xf32>
    %368 = vector.broadcast %360 : vector<16x1xf32> to vector<16x32xf32>
    %369 = arith.subf %356, %368 : vector<16x32xf32>
    %cst_100 = arith.constant 9.99999974E-6 : f32
    %370 = vector.broadcast %cst_100 : f32 to vector<16x1xf32>
    %371 = arith.addf %367, %370 : vector<16x1xf32>
    %372 = math.rsqrt %371 : vector<16x1xf32>
    %373 = vector.broadcast %372 : vector<16x1xf32> to vector<16x32xf32>
    %374 = arith.mulf %369, %373 : vector<16x32xf32>
    %375 = vector.broadcast %219 : vector<1x32xf32> to vector<16x32xf32>
    %376 = arith.mulf %374, %375 : vector<16x32xf32>
    %377 = vector.broadcast %220 : vector<1x32xf32> to vector<16x32xf32>
    %378 = arith.addf %376, %377 : vector<16x32xf32>
    %c0_101 = arith.constant 0 : index
    %c0_102 = arith.constant 0 : index
    %379 = vector.load %arg4[%c0_101, %c0_102] : memref<16x32xf32, #tpu.memory_space<vmem>>, vector<16x32xf32>
    tpu.vector_store %arg4[%c0_101, %c0_102], %378 {strides = array<i32>} : memref<16x32xf32, #tpu.memory_space<vmem>>, vector<16x32xf32>,
    return
  }
}

</mosaic_0001>

<bundles_post_ra>
// kernel: item_based_attention_block.1
= control target key start
LH: loop header
LB: loop body
LE: loop exit
PB: predicated region body
PF: predicated region fallthrough
CT: control target
= control target key end

     0   :  { %v20_v0 = vlaneseq  ;;  %s2287_s0 = inlined_call_operand.vmem [shape: f32[16,32], index: 0, kind: input, shape index: {}]   ;;  %s2288_s1 = inlined_call_operand.vmem [shape: f32[1,16], index: 1, kind: input, shape index: {}]   ;;  %s2289_s2 = inlined_call_operand.vmem [shape: bf16[320,96], index: 2, kind: input, shape index: {}]   ;;  %s2290_s3 = inlined_call_operand.vmem [shape: f32[32,96], index: 3, kind: input, shape index: {}]   ;;  %s2291_s4 = inlined_call_operand.hbm [shape: f32[16,32], index: 4, kind: output, shape index: {}]  }
   0x1   :  { %v1731_v1 = vld [vmem:[%s2288_s1] ss:$0 sm:$0xff] }
   0x2   :  { %v21_v2 = vshrl.u32 %v20_v0, 7  ;;  %v24_v3 = vand.u32 127, %v20_v0 }
   0x3   :  { %9 = vsyncpa [#allocation3], 0  ;;  %vm55_vm0 = vcmask 130048   ;;  %v1701_v20 = vld [vmem:[%s2289_s2 + $0x8] sm:$0xff]  ;;  %v1700_v21 = vld [vmem:[%s2289_s2] sm:$0xff]  ;;  %vm106_vm9 = vcmask 261120  }
   0x4   :  { %v25_v4 = vcvt.s32.f32 %v21_v2  ;;  %v31_v5 = vcvt.s32.f32 %v24_v3  ;;  %vm40_vm1 = vcmp.le.s32.totalorder %v24_v3, %v21_v2  ;;  %vm48_vm2 = vcmp.eq.s32.totalorder %v21_v2, %v24_v3  ;;  %116 = vmatpush.bf16.msra.mxu0 %v1701_v20  ;;  %v62_v24 = vld [vmem:[%s2290_s3] sm:$0xff]  ;;  %v64_v29 = vld [vmem:[%s2287_s0 + $0x8] sm:$0xff]  ;;  %v1918_v34 = vld [vmem:[%s2290_s3 + $0x10] sm:$0xff]  ;;  %s1844_s5 = smov 56   ;;  %s1845_s6 = smov 64  }
   0x5   :  { %v53_v6 = vsel %vm48_vm2, %v1731_v1, 0.0  ;;  %v22_v7 = vadd.s32 8, %v21_v2  ;;  %v63_v28 = vld [vmem:[%s2287_s0] sm:$0xff]  ;;  %v93_v35 = vperm.slane %v1918_v34, 0  ;;  %s1840_s0 = smov 96   ;;  %vm179_vm10 = vcmask 1043456  }
   0x6   :  { %v27_v8 = vmul.f32 0.125, %v25_v4  ;;  %v32_v9 = vmul.f32 0.125, %v31_v5  ;;  %v56_v10 = vsel %vm55_vm0, %v53_v6, 0.0  ;;  %vm175_vm11 = vcmask 64512   ;;  %v19_v50 = vld [vmem:[%s2288_s1] sm:$0x1] }
   0x7   :  { %57 = vadd.xlane.f32.xlu0 %v56_v10  ;;  %v26_v11 = vcvt.s32.f32 %v22_v7  ;;  %vm41_vm3 = vcmp.le.s32.totalorder %v24_v3, %v22_v7  ;;  %vm49_vm4 = vcmp.eq.s32.totalorder %v22_v7, %v24_v3  ;;  %vm34_vm12 = vcmp.eq.f32.partialorder %v19_v50, 0.0  ;;  %s1843_s1 = smov 112   ;;  %s1846_s7 = smov 120   ;;  %v75_v19 = vld [vmem:[%s2289_s2 + $0x10] sm:$0xf] }
   0x8   :  { %v29_v12 = vfloor.f32 %v27_v8  ;;  %v33_v13 = vfloor.f32 %v32_v9  ;;  %v54_v15 = vsel %vm49_vm4, %v1731_v1, 0.0  ;;  %117 = vmatpush.bf16.msra.mxu0 %v1700_v21  ;;  %v1841_v51 = vmov 0   ;;  %s1847_s8 = smov 104   ;;  %s1848_s11 = smov 48  }
   0x9   :  { %v28_v14 = vmul.f32 0.125, %v26_v11  ;;  %v59_v18 = vsel %vm55_vm0, %v54_v15, 0.0  ;;  %v35_v52 = vsel %vm34_vm12, 1, %v1841_v51  ;;  %v1842_v54 = vmov -1e+09   ;;  %s1849_s12 = smov 40  }
   0xa   :  { %vm38_vm5 = vcmp.eq.f32.partialorder %v29_v12, %v33_v13  ;;  %v36_v53 = vperm.slane %v35_v52, 0  ;;  %v391_v21 = vsel %vm179_vm10, %v75_v19, 0  ;;  %s1594_s9 = sshll.u32 %s2291_s4, 4  ;;  %s1852_s10 = smov 128   ;;  %s1595_s9 = int_to_ptr.hbm [resolvable:$true] %s1594_s9 }
   0xb   :  { %vm1884_vm6 = vmand %vm38_vm5, %vm40_vm1  ;;  %v30_v17 = vfloor.f32 %v28_v14  ;;  %s1853_s13 = smov 8  }
   0xc   :  { %vm37_vm13 = vcmp.eq.s32.totalorder %v36_v53, 1 }
   0xd   :  { %vm39_vm7 = vcmp.eq.f32.partialorder %v30_v17, %v33_v13  ;;  %vm44_vm14 = vmand %vm1884_vm6, %vm37_vm13 }
   0xe   :  { %vm1889_vm8 = vmand %vm39_vm7, %vm41_vm3  ;;  %v1933_v55 = vsel %vm44_vm14, 0.0, %v1842_v54 }
   0xf   :  { %60 = vadd.xlane.f32.xlu0 %v59_v18  ;;  %vm45_vm15 = vmand %vm1889_vm8, %vm37_vm13 }
  0x10   :  { %v1939_v60 = vsel %vm45_vm15, 0.0, %v1842_v54 }
  0x7a   :  { %v58_v22 = vpop.xlane.xlu0 %57 }
  0x7b   :  { %v65_v23 = vsub.f32 1.0, %v58_v22 }
  0x7d   :  { %v67_v26 = vmul.f32 %v65_v23, %v62_v24 }
  0x7f   :  { %v1908_v31 = vadd.f32 %v67_v26, %v63_v28 }
  0x82   :  { %v61_v25 = vpop.xlane.xlu0 %60 }
  0x83   :  { %v66_v27 = vsub.f32 1.0, %v61_v25 }
  0x85   :  { %v68_v30 = vmul.f32 %v66_v27, %v62_v24 }
  0x87   :  { %v1910_v32 = vadd.f32 %v68_v30, %v64_v29 }
  0x89   :  { %v92_v33 = vpack.c.bf16 %v1910_v32, %v1908_v31 }
  0x8b   :  { %1614 = vmatmul.msk.bf16.vlgmr.msra.gmra.mxu0 %vm106_vm9, %v92_v33 }
 0x108   :  { %v119_v36 = vpop.f32.mrf.mxu0 }
 0x109   :  { %v120_v37 = vadd.f32 %v119_v36, %v93_v35 }
 0x10b   :  { %128 = vrot.lane.b32.xlu1 %v120_v37, %s1840_s0  ;;  %v124_v39 = vpack.c.bf16 %v120_v37, %v120_v37 }
 0x10d   :  { %v172_v42 = vunpack.c.l.b16 %v124_v39 }
 0x110   :  { %v121_v38 = vpop.f32.mrf.mxu0 }
 0x111   :  { %v122_v40 = vadd.f32 %v121_v38, %v93_v35 }
 0x113   :  { %v125_v41 = vpack.c.bf16 %v122_v40, %v122_v40  ;;  %130 = vrot.lane.b32.xlu1 %v122_v40, %s1840_s0 }
 0x115   :  { %v173_v43 = vunpack.c.l.b16 %v125_v41 }
 0x117   :  { %v1923_v44 = vpack.c.b16 %v173_v43, %v172_v42 }
 0x17d   :  { %v129_v45 = vpop.permute.xlu1 %128 }
 0x17e   :  { %134 = vxpose.xlu2.b32.start [1/2] (short) (narrow) %v129_v45, 32 }
 0x185   :  { %v131_v46 = vpop.permute.xlu1 %130 }
 0x186   :  { %135 = vxpose.xlu2.b32.end [2/2] (short) (narrow) %v131_v46, 32 }
 0x217   :  { %v150_v47 = vpop.trf.xlu2 }
 0x218   :  { %v166_v48 = vpack.c.bf16 %v150_v47, %v150_v47 }
 0x21a   :  { %v181_v49 = vsel %vm179_vm10, %v166_v48, 0 }
 0x21b   :  { %190 = vmatpush.bf16.msra.mxu1 %v181_v49 }
 0x21e   :  { %1615 = vmatmul.msk.bf16.vlgmr.msra.gmra.mxu1 %vm175_vm11, %v1923_v44 }
 0x21f   :  { %v151_v1 = vpop.trf.xlu2 }
 0x220   :  { %v167_v15 = vpack.c.bf16 %v151_v1, %v151_v1 }
 0x222   :  { %v277_v16 = vsel %vm179_vm10, %v167_v15, 0 }
 0x223   :  { %286 = vmatpush.bf16.msra.mxu3 %v277_v16 }
 0x227   :  { %v152_v2 = vpop.trf.xlu2  ;;  %400 = vmatpush.bf16.msrb.mxu3 %v391_v21 }
 0x228   :  { %v168_v3 = vpack.c.bf16 %v152_v2, %v152_v2 }
 0x22a   :  { %v413_v4 = vsel %vm179_vm10, %v168_v3, 0 }
 0x22b   :  { %422 = vmatpush.bf16.msrb.mxu0 %v413_v4 }
 0x22f   :  { %v153_v18 = vpop.trf.xlu2 }
 0x230   :  { %v169_v52 = vpack.c.bf16 %v153_v18, %v153_v18 }
 0x232   :  { %v531_v54 = vsel %vm179_vm10, %v169_v52, 0 }
 0x29b   :  { %v192_v56 = vpop.f32.mrf.mxu1 }
 0x29c   :  { %v197_v57 = vmul.f32 0.35355338, %v192_v56 }
 0x29e   :  { %v199_v58 = vadd.f32 %v197_v57, %v1933_v55 }
 0x2a0   :  { %v201_v59 = vsel %vm55_vm0, %v199_v58, -inf }
 0x2a1   :  { %202 = vmax.xlane.f32.xlu0 %v201_v59 }
 0x2a3   :  { %v194_v61 = vpop.f32.mrf.mxu1 }
 0x2a4   :  { %v198_v62 = vmul.f32 0.35355338, %v194_v61 }
 0x2a6   :  { %v200_v63 = vadd.f32 %v198_v62, %v1939_v60 }
 0x2a8   :  { %v204_v0 = vsel %vm55_vm0, %v200_v63, -inf }
 0x2a9   :  { %205 = vmax.xlane.f32.xlu1 %v204_v0 }
 0x2c2   :  { %407 = vrot.lane.b32.xlu1 %v1923_v44, %s1843_s1 }
 0x314   :  { %v203_v5 = vpop.xlane.xlu0 %202 }
 0x315   :  { %v207_v6 = vsub.f32 %v199_v58, %v203_v5 }
 0x317   :  { %v209_v7 = vmul.f32 1.442695, %v207_v6 }
 0x319   :  { %1732 = vpow2.f32 %v209_v7 }
 0x31c   :  { %v206_v8 = vpop.xlane.xlu1 %205 }
 0x31d   :  { %v208_v9 = vsub.f32 %v200_v63, %v206_v8 }
 0x31f   :  { %v1733_v10 = vpop.eup %1732  ;;  %v211_v11 = vmul.f32 1.442695, %v208_v9 }
 0x320   :  { %v213_v12 = vsel %vm55_vm0, %v1733_v10, 0.0 }
 0x321   :  { %1734 = vpow2.f32 %v211_v11  ;;  %214 = vadd.xlane.f32.xlu2 %v213_v12 }
 0x327   :  { %v1735_v13 = vpop.eup %1734 }
 0x328   :  { %v216_v14 = vsel %vm55_vm0, %v1735_v13, 0.0 }
 0x329   :  { %217 = vadd.xlane.f32.xlu0 %v216_v14 }
 0x334   :  { %v408_v17 = vpop.permute.xlu1 %407 }
 0x335   :  { %1621 = vmatmul.msk.bf16.vlgmr.msrb.gmra.mxu0 %vm175_vm11, %v408_v17 }
 0x339   :  { %346 = vrot.lane.b32.xlu2 %v1923_v44, %s1844_s5 }
 0x33d   :  { %250 = vrot.lane.b32.xlu0 %v1923_v44, %s1845_s6 }
 0x345   :  { %271 = vrot.lane.b32.xlu0 %v1923_v44, %s1846_s7 }
 0x34d   :  { %525 = vrot.lane.b32.xlu0 %v1923_v44, %s1847_s8 }
 0x394   :  { %v215_v20 = vpop.xlane.xlu2 %214 }
 0x395   :  { %1736 = vrcp.f32 %v215_v20  ;;  %v230_v33 = vand.u32 2147483648, %v215_v20  ;;  %vm224_vm2 = vweird.f32 %v215_v20  ;;  %v228_v35 = vand.u32 2147483647, %v215_v20 }
 0x397   :  { %v231_v41 = vor.u32 1.1754944e-38, %v230_v33  ;;  %vm229_vm5 = vcmp.eq.f32.partialorder %v228_v35, 8.507059e+37 }
 0x39b   :  { %v1737_v22 = vpop.eup %1736 }
 0x39c   :  { %v220_v23 = vmul.f32 %v1737_v22, %v215_v20  ;;  %v347_v24 = vpop.permute.xlu2 %346  ;;  %v218_v25 = vpop.xlane.xlu0 %217  ;;  %vm225_vm1 = vweird.f32 %v1737_v22 }
 0x39d   :  { %1738 = vrcp.f32 %v218_v25  ;;  %359 = vmatpush.bf16.msrb.mxu1 %v347_v24  ;;  %vm226_vm3 = vmor %vm224_vm2, %vm225_vm1  ;;  %v245_v37 = vand.u32 2147483648, %v218_v25  ;;  %v243_v39 = vand.u32 2147483647, %v218_v25  ;;  %vm239_vm6 = vweird.f32 %v218_v25 }
 0x39e   :  { %v221_v26 = vsub.f32 1.0, %v220_v23 }
 0x39f   :  { %v246_v43 = vor.u32 1.1754944e-38, %v245_v37  ;;  %vm244_vm8 = vcmp.eq.f32.partialorder %v243_v39, 8.507059e+37 }
 0x3a0   :  { %v222_v27 = vmul.f32 %v1737_v22, %v221_v26 }
 0x3a2   :  { %v223_v29 = vadd.f32 %v1737_v22, %v222_v27 }
 0x3a3   :  { %v1739_v28 = vpop.eup %1738 }
 0x3a4   :  { %v235_v30 = vmul.f32 %v1739_v28, %v218_v25  ;;  %vm240_vm4 = vweird.f32 %v1739_v28  ;;  %v227_v40 = vsel %vm226_vm3, %v1737_v22, %v223_v29 }
 0x3a5   :  { %vm241_vm7 = vmor %vm239_vm6, %vm240_vm4  ;;  %v232_v45 = vsel %vm229_vm5, %v231_v41, %v227_v40 }
 0x3a6   :  { %v236_v36 = vsub.f32 1.0, %v235_v30  ;;  %v233_v48 = vmul.f32 %v1733_v10, %v232_v45 }
 0x3a8   :  { %v237_v38 = vmul.f32 %v1739_v28, %v236_v36 }
 0x3aa   :  { %v238_v42 = vadd.f32 %v1739_v28, %v237_v38 }
 0x3ac   :  { %v242_v46 = vsel %vm241_vm7, %v1739_v28, %v238_v42 }
 0x3ad   :  { %v247_v47 = vsel %vm244_vm8, %v246_v43, %v242_v46 }
 0x3ae   :  { %v248_v49 = vmul.f32 %v1735_v13, %v247_v47 }
 0x3af   :  { %v251_v50 = vpop.permute.xlu0 %250 }
 0x3b0   :  { %263 = vmatpush.bf16.msra.mxu2 %v251_v50  ;;  %v249_v51 = vpack.c.bf16 %v248_v49, %v233_v48 }
 0x3b2   :  { %v424_v57 = vpop.f32.mrf.mxu0 }
 0x3b3   :  { %1616 = vmatmul.msk.bf16.vlgmr.msra.gmra.mxu2 %vm55_vm0, %v249_v51  ;;  %v429_v0 = vmul.f32 0.35355338, %v424_v57 }
 0x3b5   :  { %v431_v4 = vadd.f32 %v429_v0, %v1933_v55 }
 0x3b7   :  { %v272_v53 = vpop.permute.xlu0 %271  ;;  %v433_v8 = vsel %vm55_vm0, %v431_v4, -inf }
 0x3b8   :  { %1617 = vmatmul.msk.bf16.vlgmr.msra.gmra.mxu3 %vm175_vm11, %v272_v53 }
 0x3b9   :  { %540 = vmatpush.bf16.msra.mxu3 %v531_v54 }
 0x3ba   :  { %v426_v5 = vpop.f32.mrf.mxu0 }
 0x3bb   :  { %v430_v7 = vmul.f32 0.35355338, %v426_v5 }
 0x3bd   :  { %v432_v10 = vadd.f32 %v430_v7, %v1939_v60 }
 0x3bf   :  { %v526_v11 = vpop.permute.xlu0 %525  ;;  %v436_v12 = vsel %vm55_vm0, %v432_v10, -inf }
 0x436   :  { %v265_v56 = vpop.f32.mrf.mxu2 }
 0x43b   :  { %v288_v58 = vpop.f32.mrf.mxu3 }
 0x43c   :  { %v293_v59 = vmul.f32 0.35355338, %v288_v58 }
 0x43e   :  { %v267_v61 = vpop.f32.mrf.mxu2  ;;  %v295_v62 = vadd.f32 %v293_v59, %v1933_v55 }
 0x43f   :  { %v270_v63 = vpack.c.bf16 %v267_v61, %v265_v56 }
 0x440   :  { %v297_v1 = vsel %vm55_vm0, %v295_v62, -inf }
 0x441   :  { %1620 = vmatmul.msk.bf16.vlgmr.msrb.gmra.mxu3 %vm175_vm11, %v270_v63  ;;  %298 = vmax.xlane.f32.xlu0 %v297_v1 }
 0x443   :  { %v290_v2 = vpop.f32.mrf.mxu3 }
 0x444   :  { %v294_v3 = vmul.f32 0.35355338, %v290_v2 }
 0x446   :  { %v296_v6 = vadd.f32 %v294_v3, %v1939_v60 }
 0x448   :  { %v300_v9 = vsel %vm55_vm0, %v296_v6, -inf }
 0x449   :  { %434 = vmax.xlane.f32.xlu0 %v433_v8  ;;  %301 = vmax.xlane.f32.xlu1 %v300_v9 }
 0x451   :  { %437 = vmax.xlane.f32.xlu0 %v436_v12  ;;  %1624 = vmatmul.msk.bf16.vlgmr.msra.gmra.mxu3 %vm175_vm11, %v526_v11 }
 0x4b4   :  { %v299_v14 = vpop.xlane.xlu0 %298 }
 0x4b5   :  { %v303_v16 = vsub.f32 %v295_v62, %v299_v14 }
 0x4b7   :  { %v305_v18 = vmul.f32 1.442695, %v303_v16 }
 0x4b9   :  { %1740 = vpow2.f32 %v305_v18 }
 0x4bc   :  { %v435_v17 = vpop.xlane.xlu0 %434  ;;  %v302_v19 = vpop.xlane.xlu1 %301 }
 0x4bd   :  { %v304_v22 = vsub.f32 %v296_v6, %v302_v19  ;;  %v439_v24 = vsub.f32 %v431_v4, %v435_v17 }
 0x4bf   :  { %v307_v26 = vmul.f32 1.442695, %v304_v22  ;;  %v441_v27 = vmul.f32 1.442695, %v439_v24  ;;  %v1981_v33 = vpop.eup %1740 }
 0x4c0   :  { %v309_v38 = vsel %vm55_vm0, %v1981_v33, 0.0 }
 0x4c1   :  { %1742 = vpow2.f32 %v307_v26 }
 0x4c2   :  { %1744 = vpow2.f32 %v441_v27 }
 0x4c4   :  { %v1975_v13 = vpop.f32.mrf.mxu3  ;;  %v438_v29 = vpop.xlane.xlu0 %437 }
 0x4c5   :  { %v440_v36 = vsub.f32 %v432_v10, %v438_v29 }
 0x4c7   :  { %v443_v39 = vmul.f32 1.442695, %v440_v36  ;;  %v1743_v40 = vpop.eup %1742 }
 0x4c8   :  { %v1987_v41 = vpop.eup %1744  ;;  %v312_v42 = vsel %vm55_vm0, %v1743_v40, 0.0 }
 0x4c9   :  { %1746 = vpow2.f32 %v443_v39  ;;  %v445_v43 = vsel %vm55_vm0, %v1987_v41, 0.0 }
 0x4cc   :  { %v1977_v15 = vpop.f32.mrf.mxu3 }
 0x4cf   :  { %v1992_v45 = vpop.eup %1746 }
 0x4d0   :  { %v448_v46 = vsel %vm55_vm0, %v1992_v45, 0.0 }
 0x4d4   :  { %v542_v20 = vpop.f32.mrf.mxu3 }
 0x4d5   :  { %v547_v21 = vmul.f32 0.35355338, %v542_v20 }
 0x4d7   :  { %v549_v23 = vadd.f32 %v547_v21, %v1933_v55 }
 0x4d9   :  { %v551_v25 = vsel %vm55_vm0, %v549_v23, -inf }
 0x4da   :  { %552 = vmax.xlane.f32.xlu1 %v551_v25 }
 0x4dc   :  { %v544_v28 = vpop.f32.mrf.mxu3 }
 0x4dd   :  { %v548_v30 = vmul.f32 0.35355338, %v544_v28 }
 0x4df   :  { %v550_v35 = vadd.f32 %v548_v30, %v1939_v60 }
 0x4e1   :  { %v554_v37 = vsel %vm55_vm0, %v550_v35, -inf }
 0x4e2   :  { %555 = vmax.xlane.f32.xlu0 %v554_v37  ;;  %310 = vadd.xlane.f32.xlu1 %v309_v38 }
 0x4ea   :  { %313 = vadd.xlane.f32.xlu0 %v312_v42  ;;  %446 = vadd.xlane.f32.xlu1 %v445_v43 }
 0x4f2   :  { %449 = vadd.xlane.f32.xlu0 %v448_v46 }
 0x54d   :  { %v553_v47 = vpop.xlane.xlu1 %552 }
 0x54e   :  { %v557_v48 = vsub.f32 %v549_v23, %v553_v47 }
 0x550   :  { %v559_v49 = vmul.f32 1.442695, %v557_v48 }
 0x552   :  { %1748 = vpow2.f32 %v559_v49 }
 0x555   :  { %v311_v50 = vpop.xlane.xlu1 %310  ;;  %v556_v51 = vpop.xlane.xlu0 %555 }
 0x556   :  { %1750 = vrcp.f32 %v311_v50  ;;  %v558_v52 = vsub.f32 %v550_v35, %v556_v51  ;;  %v326_v4 = vand.u32 2147483648, %v311_v50  ;;  %vm320_vm13 = vweird.f32 %v311_v50 }
 0x557   :  { %v324_v5 = vand.u32 2147483647, %v311_v50 }
 0x558   :  { %v1996_v53 = vpop.eup %1748  ;;  %v561_v54 = vmul.f32 1.442695, %v558_v52  ;;  %v327_v11 = vor.u32 1.1754944e-38, %v326_v4 }
 0x559   :  { %v563_v56 = vsel %vm55_vm0, %v1996_v53, 0.0  ;;  %vm325_vm1 = vcmp.eq.f32.partialorder %v324_v5, 8.507059e+37 }
 0x55a   :  { %564 = vadd.xlane.f32.xlu1 %v563_v56  ;;  %1752 = vpow2.f32 %v561_v54 }
 0x55c   :  { %v1751_v57 = vpop.eup %1750 }
 0x55d   :  { %v316_v58 = vmul.f32 %v1751_v57, %v311_v50  ;;  %v314_v59 = vpop.xlane.xlu0 %313  ;;  %vm321_vm12 = vweird.f32 %v1751_v57  ;;  %v447_v23 = vpop.xlane.xlu1 %446 }
 0x55e   :  { %1754 = vrcp.f32 %v314_v59  ;;  %vm322_vm14 = vmor %vm320_vm13, %vm321_vm12  ;;  %v341_v7 = vand.u32 2147483648, %v314_v59  ;;  %v339_v10 = vand.u32 2147483647, %v314_v59  ;;  %vm335_vm2 = vweird.f32 %v314_v59 }
 0x55f   :  { %v317_v61 = vsub.f32 1.0, %v316_v58  ;;  %v460_v48 = vand.u32 2147483647, %v447_v23  ;;  %v462_v49 = vand.u32 2147483648, %v447_v23  ;;  %vm456_vm8 = vweird.f32 %v447_v23 }
 0x560   :  { %v2000_v62 = vpop.eup %1752  ;;  %v342_v14 = vor.u32 1.1754944e-38, %v341_v7  ;;  %vm340_vm4 = vcmp.eq.f32.partialorder %v339_v10, 8.507059e+37 }
 0x561   :  { %v318_v63 = vmul.f32 %v1751_v57, %v317_v61  ;;  %v566_v0 = vsel %vm55_vm0, %v2000_v62, 0.0  ;;  %v463_v61 = vor.u32 1.1754944e-38, %v462_v49 }
 0x562   :  { %567 = vadd.xlane.f32.xlu0 %v566_v0 }
 0x563   :  { %v319_v2 = vadd.f32 %v1751_v57, %v318_v63 }
 0x564   :  { %v1755_v1 = vpop.eup %1754 }
 0x565   :  { %v331_v3 = vmul.f32 %v1755_v1, %v314_v59  ;;  %v323_v8 = vsel %vm322_vm14, %v1751_v57, %v319_v2  ;;  %vm336_vm15 = vweird.f32 %v1755_v1  ;;  %v450_v22 = vpop.xlane.xlu0 %449 }
 0x566   :  { %vm337_vm3 = vmor %vm335_vm2, %vm336_vm15  ;;  %v328_v16 = vsel %vm325_vm1, %v327_v11, %v323_v8  ;;  %1756 = vrcp.f32 %v450_v22  ;;  %v477_v42 = vand.u32 2147483648, %v450_v22  ;;  %vm471_vm7 = vweird.f32 %v450_v22 }
 0x567   :  { %v332_v6 = vsub.f32 1.0, %v331_v3  ;;  %v329_v19 = vmul.f32 %v1981_v33, %v328_v16  ;;  %1758 = vrcp.f32 %v447_v23  ;;  %v475_v50 = vand.u32 2147483647, %v450_v22 }
 0x568   :  { %v478_v56 = vor.u32 1.1754944e-38, %v477_v42  ;;  %vm461_vm15 = vcmp.eq.f32.partialorder %v460_v48, 8.507059e+37 }
 0x569   :  { %v333_v9 = vmul.f32 %v1755_v1, %v332_v6  ;;  %vm476_vm1 = vcmp.eq.f32.partialorder %v475_v50, 8.507059e+37 }
 0x56b   :  { %v334_v12 = vadd.f32 %v1755_v1, %v333_v9 }
 0x56c   :  { %v1757_v24 = vpop.eup %1756 }
 0x56d   :  { %v338_v17 = vsel %vm337_vm3, %v1755_v1, %v334_v12  ;;  %v1759_v25 = vpop.eup %1758  ;;  %v467_v26 = vmul.f32 %v1757_v24, %v450_v22  ;;  %vm472_vm5 = vweird.f32 %v1757_v24 }
 0x56e   :  { %v343_v18 = vsel %vm340_vm4, %v342_v14, %v338_v17  ;;  %v452_v28 = vmul.f32 %v1759_v25, %v447_v23  ;;  %vm457_vm6 = vweird.f32 %v1759_v25  ;;  %vm473_vm12 = vmor %vm471_vm7, %vm472_vm5 }
 0x56f   :  { %v344_v20 = vmul.f32 %v1743_v40, %v343_v18  ;;  %v468_v29 = vsub.f32 1.0, %v467_v26  ;;  %vm2014_vm13 = vmor %vm456_vm8, %vm457_vm6 }
 0x570   :  { %v453_v30 = vsub.f32 1.0, %v452_v28 }
 0x571   :  { %v345_v21 = vpack.c.bf16 %v344_v20, %v329_v19  ;;  %v469_v35 = vmul.f32 %v1757_v24, %v468_v29 }
 0x572   :  { %v454_v37 = vmul.f32 %v1759_v25, %v453_v30 }
 0x573   :  { %482 = vrot.lane.b32.xlu1 %v1923_v44, %s1848_s11  ;;  %1618 = vmatmul.msk.bf16.vlgmr.msrb.gmra.mxu1 %vm55_vm0, %v345_v21  ;;  %v470_v40 = vadd.f32 %v1757_v24, %v469_v35 }
 0x574   :  { %v455_v46 = vadd.f32 %v1759_v25, %v454_v37 }
 0x575   :  { %v474_v54 = vsel %vm473_vm12, %v1757_v24, %v470_v40 }
 0x576   :  { %600 = vrot.lane.b32.xlu0 %v1923_v44, %s1849_s12  ;;  %v76_v44 = vld [vmem:[%s2289_s2 + $0x14] sm:$0xf]  ;;  %v459_v57 = vsel %vm2014_vm13, %v1759_v25, %v455_v46  ;;  %v479_v0 = vsel %vm476_vm1, %v478_v56, %v474_v54  ;;  %v77_v25 = vld [vmem:[%s2289_s2 + $0x18] sm:$0xf] }
 0x577   :  { %v371_v43 = vsel %vm179_vm10, %v76_v44, 0  ;;  %v464_v3 = vsel %vm461_vm15, %v463_v61, %v459_v57  ;;  %v480_v8 = vmul.f32 %v1992_v45, %v479_v0 }
 0x578   :  { %380 = vmatpush.bf16.msrb.mxu2 %v371_v43  ;;  %v465_v11 = vmul.f32 %v1987_v41, %v464_v3  ;;  %v645_v43 = vperm.slane %v1918_v34, 1 }
 0x57a   :  { %v481_v19 = vpack.c.bf16 %v480_v8, %v465_v11  ;;  %v1703_v11 = vld [vmem:[%s2289_s2 + $0x28] sm:$0xff] }
 0x5cd   :  { %v565_v27 = vpop.xlane.xlu1 %564 }
 0x5ce   :  { %1760 = vrcp.f32 %v565_v27  ;;  %v580_v63 = vand.u32 2147483648, %v565_v27  ;;  %vm574_vm2 = vweird.f32 %v565_v27  ;;  %v578_v1 = vand.u32 2147483647, %v565_v27 }
 0x5d0   :  { %v581_v9 = vor.u32 1.1754944e-38, %v580_v63  ;;  %vm579_vm5 = vcmp.eq.f32.partialorder %v578_v1, 8.507059e+37 }
 0x5d4   :  { %v1761_v33 = vpop.eup %1760 }
 0x5d5   :  { %v570_v36 = vmul.f32 %v1761_v33, %v565_v27  ;;  %v568_v38 = vpop.xlane.xlu0 %567  ;;  %vm575_vm14 = vweird.f32 %v1761_v33 }
 0x5d6   :  { %1762 = vrcp.f32 %v568_v38  ;;  %vm576_vm3 = vmor %vm574_vm2, %vm575_vm14  ;;  %v595_v4 = vand.u32 2147483648, %v568_v38  ;;  %v593_v7 = vand.u32 2147483647, %v568_v38  ;;  %vm589_vm6 = vweird.f32 %v568_v38 }
 0x5d7   :  { %v571_v39 = vsub.f32 1.0, %v570_v36 }
 0x5d8   :  { %v596_v14 = vor.u32 1.1754944e-38, %v595_v4  ;;  %vm594_vm8 = vcmp.eq.f32.partialorder %v593_v7, 8.507059e+37 }
 0x5d9   :  { %v572_v47 = vmul.f32 %v1761_v33, %v571_v39 }
 0x5db   :  { %v573_v58 = vadd.f32 %v1761_v33, %v572_v47 }
 0x5dc   :  { %v1763_v51 = vpop.eup %1762 }
 0x5dd   :  { %v585_v59 = vmul.f32 %v1763_v51, %v568_v38  ;;  %v577_v5 = vsel %vm576_vm3, %v1761_v33, %v573_v58  ;;  %vm590_vm4 = vweird.f32 %v1763_v51  ;;  %v1850_v58 = vmov 32.0  }
 0x5de   :  { %v582_v12 = vsel %vm579_vm5, %v581_v9, %v577_v5  ;;  %vm591_vm7 = vmor %vm589_vm6, %vm590_vm4  ;;  %1764 = vrcp.f32 %v1850_v58  ;;  %vm764_vm4 = vcmask 523264  }
 0x5df   :  { %v586_v2 = vsub.f32 1.0, %v585_v59  ;;  %v583_v20 = vmul.f32 %v1996_v53, %v582_v12  ;;  %v507_v53 = vsel %vm179_vm10, %v77_v25, 0 }
 0x5e0   :  { %516 = vmatpush.bf16.msra.mxu2 %v507_v53 }
 0x5e1   :  { %v587_v6 = vmul.f32 %v1763_v51, %v586_v2 }
 0x5e3   :  { %v588_v10 = vadd.f32 %v1763_v51, %v587_v6 }
 0x5e4   :  { %v1765_v59 = vpop.eup %1764 }
 0x5e5   :  { %v483_v16 = vpop.permute.xlu1 %482  ;;  %v592_v17 = vsel %vm591_vm7, %v1763_v51, %v588_v10  ;;  %vm659_vm12 = vweird.f32 %v1765_v59 }
 0x5e6   :  { %495 = vmatpush.bf16.msra.mxu1 %v483_v16  ;;  %v597_v18 = vsel %vm594_vm8, %v596_v14, %v592_v17  ;;  %v1702_v16 = vld [vmem:[%s2289_s2 + $0x20] sm:$0xff] }
 0x5e7   :  { %v598_v21 = vmul.f32 %v2000_v62, %v597_v18  ;;  %v78_v62 = vld [vmem:[%s2289_s2 + $0x1c] sm:$0xf] }
 0x5e8   :  { %v601_v45 = vpop.permute.xlu0 %600  ;;  %v625_v26 = vsel %vm179_vm10, %v78_v62, 0 }
 0x5e9   :  { %1622 = vmatmul.msk.bf16.vlgmr.msra.gmra.mxu1 %vm55_vm0, %v481_v19  ;;  %613 = vmatpush.bf16.msra.mxu0 %v601_v45  ;;  %v599_v22 = vpack.c.bf16 %v598_v21, %v583_v20 }
 0x5ea   :  { %634 = vmatpush.bf16.msrb.mxu1 %v625_v26 }
 0x5ec   :  { %1625 = vmatmul.msk.bf16.vlgmr.msra.gmra.mxu0 %vm55_vm0, %v599_v22 }
 0x5f0   :  { %v361_v41 = vpop.f32.mrf.mxu1 }
 0x5f8   :  { %v363_v23 = vpop.f32.mrf.mxu1 }
 0x5f9   :  { %v366_v24 = vpack.c.bf16 %v363_v23, %v361_v41 }
 0x5fb   :  { %1619 = vmatmul.msk.bf16.vlgmr.msrb.gmra.mxu2 %vm175_vm11, %v366_v24 }
 0x5fc   :  { %728 = vmatpush.bf16.msrb.mxu2 %v1703_v11 }
 0x600   :  { %729 = vmatpush.bf16.msrb.mxu2 %v1702_v16 }
 0x666   :  { %v497_v27 = vpop.f32.mrf.mxu1 }
 0x669   :  { %v615_v28 = vpop.f32.mrf.mxu0 }
 0x66e   :  { %v499_v29 = vpop.f32.mrf.mxu1 }
 0x66f   :  { %v502_v30 = vpack.c.bf16 %v499_v29, %v497_v27 }
 0x671   :  { %1623 = vmatmul.msk.bf16.vlgmr.msra.gmra.mxu2 %vm175_vm11, %v502_v30  ;;  %v617_v33 = vpop.f32.mrf.mxu0 }
 0x672   :  { %v620_v35 = vpack.c.bf16 %v617_v33, %v615_v28  ;;  %v699_v28 = vperm.slane %v1918_v34, 4 }
 0x674   :  { %1626 = vmatmul.msk.bf16.vlgmr.msrb.gmra.mxu1 %vm175_vm11, %v620_v35  ;;  %v702_v35 = vperm.slane %v1918_v34, 5 }
 0x67e   :  { %v382_v36 = vpop.f32.mrf.mxu2 }
 0x67f   :  { %v403_v38 = vadd.f32 %v1975_v13, %v382_v36 }
 0x686   :  { %v384_v37 = vpop.f32.mrf.mxu2 }
 0x687   :  { %v405_v47 = vadd.f32 %v1977_v15, %v384_v37 }
 0x6f1   :  { %v636_v39 = vpop.f32.mrf.mxu1 }
 0x6f4   :  { %v518_v44 = vpop.f32.mrf.mxu2 }
 0x6f5   :  { %v523_v40 = vadd.f32 %v518_v44, %v403_v38 }
 0x6f7   :  { %v641_v42 = vadd.f32 %v636_v39, %v523_v40 }
 0x6f9   :  { %v643_v46 = vadd.f32 %v641_v42, %v1908_v31  ;;  %v638_v52 = vpop.f32.mrf.mxu1  ;;  %v655_v31 = vmul.f32 32.0, %v1765_v59  ;;  %v1707_v42 = vld [vmem:[%s2289_s2 + $0x48] sm:$0xff] }
 0x6fa   :  { %772 = vmatpush.bf16.msrb.mxu3 %v1707_v42 }
 0x6fb   :  { %v646_v48 = vadd.f32 %v645_v43, %v643_v46  ;;  %v656_v61 = vsub.f32 1.0, %v655_v31  ;;  %v1705_v46 = vld [vmem:[%s2289_s2 + $0x38] sm:$0xff] }
 0x6fc   :  { %v520_v49 = vpop.f32.mrf.mxu2 }
 0x6fd   :  { %v524_v50 = vadd.f32 %v520_v49, %v405_v47  ;;  %v648_v51 = vsel %vm106_vm9, %v646_v48, 0.0  ;;  %v657_v15 = vmul.f32 %v1765_v59, %v656_v61  ;;  %v1704_v47 = vld [vmem:[%s2289_s2 + $0x30] sm:$0xff]  ;;  %v706_v49 = vperm.slane %v1918_v34, 2 }
 0x6fe   :  { %649 = vadd.xlane.f32.xlu2 %v648_v51 }
 0x6ff   :  { %v642_v54 = vadd.f32 %v638_v52, %v524_v50  ;;  %v658_v63 = vadd.f32 %v1765_v59, %v657_v15 }
 0x701   :  { %v644_v13 = vadd.f32 %v642_v54, %v1910_v32  ;;  %v2044_v0 = vsel %vm659_vm12, %v1765_v59, %v658_v63 }
 0x703   :  { %v647_v56 = vadd.f32 %v645_v43, %v644_v13  ;;  %v1706_v43 = vld [vmem:[%s2289_s2 + $0x40] sm:$0xff] }
 0x704   :  { %773 = vmatpush.bf16.msrb.mxu3 %v1706_v43 }
 0x705   :  { %v651_v57 = vsel %vm106_vm9, %v647_v56, 0.0 }
 0x706   :  { %652 = vadd.xlane.f32.xlu0 %v651_v57  ;;  %v739_v57 = vperm.slane %v1918_v34, 3 }
 0x708   :  { %774 = vmatpush.bf16.msrb.mxu3 %v1705_v46  ;;  %v2102_v46 = vld [vmem:[%s2290_s3 + $0x18] sm:$0xff] }
 0x70c   :  { %775 = vmatpush.bf16.msrb.mxu3 %v1704_v47  ;;  %v856_v47 = vperm.slane %v2102_v46, 0 }
 0x771   :  { %v650_v1 = vpop.xlane.xlu2 %649 }
 0x772   :  { %v661_v2 = vmul.f32 %v2044_v0, %v650_v1 }
 0x774   :  { %v663_v3 = vsub.f32 %v646_v48, %v661_v2 }
 0x776   :  { %v665_v4 = vmul.f32 %v663_v3, %v663_v3 }
 0x778   :  { %v667_v32 = vsel %vm106_vm9, %v665_v4, 0.0 }
 0x779   :  { %668 = vadd.xlane.f32.xlu1 %v667_v32  ;;  %v653_v5 = vpop.xlane.xlu0 %652 }
 0x77a   :  { %v662_v6 = vmul.f32 %v2044_v0, %v653_v5 }
 0x77c   :  { %v664_v7 = vsub.f32 %v647_v56, %v662_v6 }
 0x77e   :  { %v666_v8 = vmul.f32 %v664_v7, %v664_v7 }
 0x780   :  { %v670_v9 = vsel %vm106_vm9, %v666_v8, 0.0 }
 0x781   :  { %671 = vadd.xlane.f32.xlu2 %v670_v9 }
 0x7ec   :  { %v669_v10 = vpop.xlane.xlu1 %668 }
 0x7ed   :  { %v673_v12 = vmul.f32 %v669_v10, %v2044_v0 }
 0x7ef   :  { %v675_v14 = vadd.f32 1e-05, %v673_v12 }
 0x7f1   :  { %1766 = vrsqrt.f32 %v675_v14  ;;  %vm683_vm14 = vweird.f32 %v675_v14 }
 0x7f4   :  { %v672_v17 = vpop.xlane.xlu2 %671 }
 0x7f5   :  { %v674_v18 = vmul.f32 %v672_v17, %v2044_v0 }
 0x7f7   :  { %v1767_v19 = vpop.eup %1766  ;;  %v676_v20 = vadd.f32 1e-05, %v674_v18  ;;  %v1708_v18 = vld [vmem:[%s2289_s2 + $0x50] sm:$0xff] }
 0x7f8   :  { %v678_v21 = vmul.f32 %v1767_v19, %v675_v14  ;;  %vm684_vm13 = vweird.f32 %v1767_v19  ;;  %v1709_v14 = vld [vmem:[%s2289_s2 + $0x58] sm:$0xff] }
 0x7f9   :  { %1768 = vrsqrt.f32 %v676_v20  ;;  %vm685_vm15 = vmor %vm683_vm14, %vm684_vm13  ;;  %vm693_vm2 = vweird.f32 %v676_v20  ;;  %878 = vmatpush.bf16.msrb.mxu0 %v1709_v14 }
 0x7fa   :  { %v679_v45 = vmul.f32 %v1767_v19, %v678_v21 }
 0x7fc   :  { %v680_v22 = vmul.f32 0.5, %v679_v45 }
 0x7fd   :  { %879 = vmatpush.bf16.msrb.mxu0 %v1708_v18 }
 0x7fe   :  { %v681_v41 = vsub.f32 1.5, %v680_v22 }
 0x7ff   :  { %v1769_v23 = vpop.eup %1768 }
 0x800   :  { %v682_v24 = vmul.f32 %v1767_v19, %v681_v41  ;;  %v688_v25 = vmul.f32 %v1769_v23, %v676_v20  ;;  %vm694_vm1 = vweird.f32 %v1769_v23 }
 0x801   :  { %vm695_vm3 = vmor %vm693_vm2, %vm694_vm1 }
 0x802   :  { %v689_v53 = vmul.f32 %v1769_v23, %v688_v25  ;;  %v686_v62 = vsel %vm685_vm15, %v1767_v19, %v682_v24 }
 0x803   :  { %v697_v29 = vmul.f32 %v686_v62, %v663_v3 }
 0x804   :  { %v690_v26 = vmul.f32 0.5, %v689_v53 }
 0x805   :  { %v700_v36 = vmul.f32 %v699_v28, %v697_v29 }
 0x806   :  { %v691_v27 = vsub.f32 1.5, %v690_v26 }
 0x807   :  { %v703_v39 = vadd.f32 %v702_v35, %v700_v36 }
 0x808   :  { %v692_v30 = vmul.f32 %v1769_v23, %v691_v27 }
 0x80a   :  { %v696_v33 = vsel %vm695_vm3, %v1769_v23, %v692_v30  ;;  %v828_v30 = vperm.slane %v1918_v34, 6 }
 0x80b   :  { %v698_v37 = vmul.f32 %v696_v33, %v664_v7 }
 0x80d   :  { %v701_v38 = vmul.f32 %v699_v28, %v698_v37  ;;  %v831_v37 = vperm.slane %v1918_v34, 7 }
 0x80f   :  { %v704_v44 = vadd.f32 %v702_v35, %v701_v38 }
 0x811   :  { %v705_v40 = vpack.c.bf16 %v704_v44, %v703_v39 }
 0x813   :  { %1635 = vmatmul.msk.bf16.vlgmr.msrb.gmra.mxu2 %vm106_vm9, %v705_v40 }
 0x896   :  { %v731_v48 = vpop.f32.mrf.mxu2 }
 0x897   :  { %v732_v50 = vadd.f32 %v731_v48, %v706_v49 }
 0x899   :  { %v736_v54 = vmax.f32 %v732_v50, 0.0 }
 0x89e   :  { %v733_v51 = vpop.f32.mrf.mxu2 }
 0x89f   :  { %v734_v52 = vadd.f32 %v733_v51, %v706_v49 }
 0x8a1   :  { %v737_v13 = vmax.f32 %v734_v52, 0.0 }
 0x8a3   :  { %v738_v56 = vpack.c.bf16 %v737_v13, %v736_v54 }
 0x8a5   :  { %1652 = vmatmul.msk.bf16.vlgmr.msrb.gmra.mxu3 %vm764_vm4, %v738_v56 }
 0x928   :  { %v777_v58 = vpop.f32.mrf.mxu3 }
 0x929   :  { %v778_v59 = vadd.f32 %v777_v58, %v739_v57 }
 0x92b   :  { %v782_v31 = vadd.f32 %v778_v59, %v703_v39 }
 0x92d   :  { %v784_v61 = vsel %vm106_vm9, %v782_v31, 0.0 }
 0x92e   :  { %785 = vadd.xlane.f32.xlu2 %v784_v61 }
 0x930   :  { %v779_v15 = vpop.f32.mrf.mxu3 }
 0x931   :  { %v780_v63 = vadd.f32 %v779_v15, %v739_v57 }
 0x933   :  { %v783_v1 = vadd.f32 %v780_v63, %v704_v44 }
 0x935   :  { %v787_v2 = vsel %vm106_vm9, %v783_v1, 0.0 }
 0x936   :  { %788 = vadd.xlane.f32.xlu0 %v787_v2 }
 0x9a1   :  { %v786_v3 = vpop.xlane.xlu2 %785 }
 0x9a2   :  { %v790_v4 = vmul.f32 %v786_v3, %v2044_v0 }
 0x9a4   :  { %v792_v32 = vsub.f32 %v782_v31, %v790_v4 }
 0x9a6   :  { %v794_v5 = vmul.f32 %v792_v32, %v792_v32 }
 0x9a8   :  { %v796_v6 = vsel %vm106_vm9, %v794_v5, 0.0 }
 0x9a9   :  { %v789_v7 = vpop.xlane.xlu0 %788  ;;  %797 = vadd.xlane.f32.xlu1 %v796_v6 }
 0x9aa   :  { %v791_v8 = vmul.f32 %v789_v7, %v2044_v0 }
 0x9ac   :  { %v793_v9 = vsub.f32 %v783_v1, %v791_v8 }
 0x9ae   :  { %v795_v10 = vmul.f32 %v793_v9, %v793_v9 }
 0x9b0   :  { %v799_v11 = vsel %vm106_vm9, %v795_v10, 0.0 }
 0x9b1   :  { %800 = vadd.xlane.f32.xlu2 %v799_v11 }
 0xa1c   :  { %v798_v12 = vpop.xlane.xlu1 %797 }
 0xa1d   :  { %v802_v16 = vmul.f32 %v798_v12, %v2044_v0 }
 0xa1f   :  { %v804_v17 = vadd.f32 1e-05, %v802_v16 }
 0xa21   :  { %1770 = vrsqrt.f32 %v804_v17  ;;  %vm812_vm6 = vweird.f32 %v804_v17 }
 0xa24   :  { %v801_v19 = vpop.xlane.xlu2 %800 }
 0xa25   :  { %v803_v20 = vmul.f32 %v801_v19, %v2044_v0 }
 0xa27   :  { %v1771_v21 = vpop.eup %1770  ;;  %v805_v45 = vadd.f32 1e-05, %v803_v20 }
 0xa28   :  { %v807_v22 = vmul.f32 %v1771_v21, %v804_v17  ;;  %vm813_vm5 = vweird.f32 %v1771_v21 }
 0xa29   :  { %1772 = vrsqrt.f32 %v805_v45  ;;  %vm814_vm7 = vmor %vm812_vm6, %vm813_vm5  ;;  %vm822_vm12 = vweird.f32 %v805_v45 }
 0xa2a   :  { %v808_v41 = vmul.f32 %v1771_v21, %v807_v22 }
 0xa2c   :  { %v809_v23 = vmul.f32 0.5, %v808_v41 }
 0xa2e   :  { %v810_v24 = vsub.f32 1.5, %v809_v23 }
 0xa2f   :  { %v1773_v25 = vpop.eup %1772 }
 0xa30   :  { %v811_v53 = vmul.f32 %v1771_v21, %v810_v24  ;;  %v817_v62 = vmul.f32 %v1773_v25, %v805_v45  ;;  %vm823_vm8 = vweird.f32 %v1773_v25 }
 0xa31   :  { %vm824_vm13 = vmor %vm822_vm12, %vm823_vm8 }
 0xa32   :  { %v818_v26 = vmul.f32 %v1773_v25, %v817_v62  ;;  %v815_v27 = vsel %vm814_vm7, %v1771_v21, %v811_v53 }
 0xa33   :  { %v826_v33 = vmul.f32 %v815_v27, %v792_v32 }
 0xa34   :  { %v819_v28 = vmul.f32 0.5, %v818_v26 }
 0xa35   :  { %v829_v38 = vmul.f32 %v828_v30, %v826_v33 }
 0xa36   :  { %v820_v29 = vsub.f32 1.5, %v819_v28 }
 0xa37   :  { %v2092_v40 = vadd.f32 %v831_v37, %v829_v38 }
 0xa38   :  { %v821_v35 = vmul.f32 %v1773_v25, %v820_v29 }
 0xa3a   :  { %v825_v36 = vsel %vm824_vm13, %v1773_v25, %v821_v35 }
 0xa3b   :  { %v827_v39 = vmul.f32 %v825_v36, %v793_v9 }
 0xa3d   :  { %v830_v44 = vmul.f32 %v828_v30, %v827_v39 }
 0xa3f   :  { %v2094_v42 = vadd.f32 %v831_v37, %v830_v44 }
 0xa41   :  { %v855_v43 = vpack.c.bf16 %v2094_v42, %v2092_v40 }
 0xa43   :  { %1661 = vmatmul.msk.bf16.vlgmr.msrb.gmra.mxu0 %vm106_vm9, %v855_v43 }
 0xac0   :  { %v881_v34 = vpop.f32.mrf.mxu0 }
 0xac1   :  { %v882_v48 = vadd.f32 %v881_v34, %v856_v47 }
 0xac3   :  { %890 = vrot.lane.b32.xlu0 %v882_v48, %s1840_s0  ;;  %v886_v50 = vpack.c.bf16 %v882_v48, %v882_v48 }
 0xac5   :  { %v934_v54 = vunpack.c.l.b16 %v886_v50 }
 0xac8   :  { %v883_v49 = vpop.f32.mrf.mxu0 }
 0xac9   :  { %v884_v51 = vadd.f32 %v883_v49, %v856_v47 }
 0xacb   :  { %v887_v52 = vpack.c.bf16 %v884_v51, %v884_v51  ;;  %892 = vrot.lane.b32.xlu1 %v884_v51, %s1840_s0  ;;  %v838_v51 = vld [vmem:[%s2289_s2 + $0x60] sm:$0xf] }
 0xacd   :  { %v935_v13 = vunpack.c.l.b16 %v887_v52 }
 0xacf   :  { %v2107_v56 = vpack.c.b16 %v935_v13, %v934_v54 }
 0xb35   :  { %v891_v57 = vpop.permute.xlu0 %890 }
 0xb36   :  { %896 = vxpose.xlu2.b32.start [1/2] (short) (narrow) %v891_v57, 32 }
 0xb3d   :  { %v893_v58 = vpop.permute.xlu1 %892 }
 0xb3e   :  { %897 = vxpose.xlu2.b32.end [2/2] (short) (narrow) %v893_v58, 32  ;;  %v1151_v58 = vsel %vm179_vm10, %v838_v51, 0 }
 0xbcf   :  { %v912_v59 = vpop.trf.xlu2 }
 0xbd0   :  { %v928_v31 = vpack.c.bf16 %v912_v59, %v912_v59 }
 0xbd2   :  { %v941_v61 = vsel %vm179_vm10, %v928_v31, 0 }
 0xbd3   :  { %950 = vmatpush.bf16.msra.mxu1 %v941_v61 }
 0xbd6   :  { %1662 = vmatmul.msk.bf16.vlgmr.msra.gmra.mxu1 %vm175_vm11, %v2107_v56 }
 0xbd7   :  { %v913_v6 = vpop.trf.xlu2 }
 0xbd8   :  { %v929_v7 = vpack.c.bf16 %v913_v6, %v913_v6 }
 0xbda   :  { %v1037_v8 = vsel %vm179_vm10, %v929_v7, 0 }
 0xbdb   :  { %1046 = vmatpush.bf16.msra.mxu3 %v1037_v8 }
 0xbdf   :  { %v914_v16 = vpop.trf.xlu2 }
 0xbe0   :  { %v930_v17 = vpack.c.bf16 %v914_v16, %v914_v16 }
 0xbe2   :  { %v1173_v21 = vsel %vm179_vm10, %v930_v17, 0 }
 0xbe3   :  { %1182 = vmatpush.bf16.msrb.mxu3 %v1173_v21 }
 0xbe7   :  { %v915_v24 = vpop.trf.xlu2 }
 0xbe8   :  { %v931_v59 = vpack.c.bf16 %v915_v24, %v915_v24 }
 0xc53   :  { %v952_v15 = vpop.f32.mrf.mxu1 }
 0xc54   :  { %v957_v63 = vmul.f32 0.35355338, %v952_v15  ;;  %v1291_v15 = vsel %vm179_vm10, %v931_v59, 0 }
 0xc56   :  { %v959_v1 = vadd.f32 %v957_v63, %v1933_v55 }
 0xc58   :  { %v961_v2 = vsel %vm55_vm0, %v959_v1, -inf }
 0xc59   :  { %962 = vmax.xlane.f32.xlu0 %v961_v2 }
 0xc5b   :  { %v954_v3 = vpop.f32.mrf.mxu1 }
 0xc5c   :  { %v958_v4 = vmul.f32 0.35355338, %v954_v3 }
 0xc5e   :  { %v960_v32 = vadd.f32 %v958_v4, %v1939_v60 }
 0xc60   :  { %v964_v5 = vsel %vm55_vm0, %v960_v32, -inf }
 0xc61   :  { %965 = vmax.xlane.f32.xlu1 %v964_v5 }
 0xc7a   :  { %1031 = vrot.lane.b32.xlu1 %v2107_v56, %s1846_s7 }
 0xc82   :  { %1167 = vrot.lane.b32.xlu1 %v2107_v56, %s1843_s1 }
 0xccc   :  { %v963_v9 = vpop.xlane.xlu0 %962 }
 0xccd   :  { %v967_v10 = vsub.f32 %v959_v1, %v963_v9 }
 0xccf   :  { %v969_v11 = vmul.f32 1.442695, %v967_v10 }
 0xcd1   :  { %1774 = vpow2.f32 %v969_v11 }
 0xcd4   :  { %v966_v12 = vpop.xlane.xlu1 %965 }
 0xcd5   :  { %v968_v14 = vsub.f32 %v960_v32, %v966_v12 }
 0xcd7   :  { %v1775_v18 = vpop.eup %1774  ;;  %v971_v19 = vmul.f32 1.442695, %v968_v14 }
 0xcd8   :  { %v973_v20 = vsel %vm55_vm0, %v1775_v18, 0.0 }
 0xcd9   :  { %1776 = vpow2.f32 %v971_v19  ;;  %974 = vadd.xlane.f32.xlu2 %v973_v20 }
 0xcdf   :  { %v1777_v45 = vpop.eup %1776 }
 0xce0   :  { %v976_v22 = vsel %vm55_vm0, %v1777_v45, 0.0 }
 0xce1   :  { %977 = vadd.xlane.f32.xlu0 %v976_v22 }
 0xcec   :  { %v1032_v41 = vpop.permute.xlu1 %1031 }
 0xced   :  { %1664 = vmatmul.msk.bf16.vlgmr.msra.gmra.mxu3 %vm175_vm11, %v1032_v41 }
 0xcf1   :  { %1360 = vrot.lane.b32.xlu2 %v2107_v56, %s1849_s12 }
 0xcf4   :  { %v1168_v23 = vpop.permute.xlu1 %1167 }
 0xcf5   :  { %1010 = vrot.lane.b32.xlu0 %v2107_v56, %s1845_s6 }
 0xcfd   :  { %1285 = vrot.lane.b32.xlu0 %v2107_v56, %s1847_s8  ;;  %1668 = vmatmul.msk.bf16.vlgmr.msrb.gmra.mxu3 %vm175_vm11, %v1168_v23 }
 0xd4c   :  { %v975_v25 = vpop.xlane.xlu2 %974 }
 0xd4d   :  { %1778 = vrcp.f32 %v975_v25  ;;  %v990_v36 = vand.u32 2147483648, %v975_v25  ;;  %vm984_vm15 = vweird.f32 %v975_v25  ;;  %v988_v37 = vand.u32 2147483647, %v975_v25 }
 0xd4f   :  { %v991_v34 = vor.u32 1.1754944e-38, %v990_v36  ;;  %vm989_vm3 = vcmp.eq.f32.partialorder %v988_v37, 8.507059e+37 }
 0xd53   :  { %v1779_v53 = vpop.eup %1778 }
 0xd54   :  { %v980_v62 = vmul.f32 %v1779_v53, %v975_v25  ;;  %v1361_v26 = vpop.permute.xlu2 %1360  ;;  %v978_v27 = vpop.xlane.xlu0 %977  ;;  %vm985_vm14 = vweird.f32 %v1779_v53 }
 0xd55   :  { %1780 = vrcp.f32 %v978_v27  ;;  %1373 = vmatpush.bf16.msra.mxu3 %v1361_v26  ;;  %vm986_vm1 = vmor %vm984_vm15, %vm985_vm14  ;;  %v1005_v39 = vand.u32 2147483648, %v978_v27  ;;  %v1003_v47 = vand.u32 2147483647, %v978_v27  ;;  %vm999_vm5 = vweird.f32 %v978_v27 }
 0xd56   :  { %v981_v28 = vsub.f32 1.0, %v980_v62 }
 0xd57   :  { %v1006_v50 = vor.u32 1.1754944e-38, %v1005_v39  ;;  %vm1004_vm7 = vcmp.eq.f32.partialorder %v1003_v47, 8.507059e+37 }
 0xd58   :  { %v982_v29 = vmul.f32 %v1779_v53, %v981_v28 }
 0xd5a   :  { %v983_v33 = vadd.f32 %v1779_v53, %v982_v29 }
 0xd5b   :  { %v1781_v30 = vpop.eup %1780 }
 0xd5c   :  { %v995_v35 = vmul.f32 %v1781_v30, %v978_v27  ;;  %v987_v44 = vsel %vm986_vm1, %v1779_v53, %v983_v33  ;;  %vm1000_vm2 = vweird.f32 %v1781_v30 }
 0xd5d   :  { %v992_v49 = vsel %vm989_vm3, %v991_v34, %v987_v44  ;;  %vm1001_vm6 = vmor %vm999_vm5, %vm1000_vm2 }
 0xd5e   :  { %v996_v38 = vsub.f32 1.0, %v995_v35  ;;  %v993_v13 = vmul.f32 %v1775_v18, %v992_v49 }
 0xd60   :  { %v997_v43 = vmul.f32 %v1781_v30, %v996_v38 }
 0xd62   :  { %v998_v48 = vadd.f32 %v1781_v30, %v997_v43 }
 0xd64   :  { %v1002_v52 = vsel %vm1001_vm6, %v1781_v30, %v998_v48 }
 0xd65   :  { %v1007_v54 = vsel %vm1004_vm7, %v1006_v50, %v1002_v52 }
 0xd66   :  { %v1008_v57 = vmul.f32 %v1777_v45, %v1007_v54 }
 0xd67   :  { %v1011_v31 = vpop.permute.xlu0 %1010 }
 0xd68   :  { %1023 = vmatpush.bf16.msra.mxu2 %v1011_v31  ;;  %v1009_v61 = vpack.c.bf16 %v1008_v57, %v993_v13 }
 0xd6b   :  { %1663 = vmatmul.msk.bf16.vlgmr.msra.gmra.mxu2 %vm55_vm0, %v1009_v61 }
 0xd6c   :  { %1160 = vmatpush.bf16.msrb.mxu2 %v1151_v58 }
 0xd6f   :  { %v1286_v16 = vpop.permute.xlu0 %1285 }
 0xd70   :  { %1300 = vmatpush.bf16.msra.mxu2 %v1291_v15  ;;  %v1048_v63 = vpop.f32.mrf.mxu3 }
 0xd71   :  { %v1053_v1 = vmul.f32 0.35355338, %v1048_v63 }
 0xd73   :  { %v1055_v2 = vadd.f32 %v1053_v1, %v1933_v55 }
 0xd75   :  { %v1057_v3 = vsel %vm55_vm0, %v1055_v2, -inf }
 0xd76   :  { %1058 = vmax.xlane.f32.xlu0 %v1057_v3 }
 0xd78   :  { %v1050_v4 = vpop.f32.mrf.mxu3 }
 0xd79   :  { %v1054_v32 = vmul.f32 0.35355338, %v1050_v4 }
 0xd7b   :  { %v1056_v5 = vadd.f32 %v1054_v32, %v1939_v60 }
 0xd7d   :  { %v1060_v6 = vsel %vm55_vm0, %v1056_v5, -inf }
 0xd7e   :  { %1061 = vmax.xlane.f32.xlu1 %v1060_v6 }
 0xd80   :  { %v1184_v7 = vpop.f32.mrf.mxu3 }
 0xd81   :  { %v1189_v8 = vmul.f32 0.35355338, %v1184_v7 }
 0xd83   :  { %v1191_v9 = vadd.f32 %v1189_v8, %v1933_v55 }
 0xd85   :  { %v1193_v10 = vsel %vm55_vm0, %v1191_v9, -inf }
 0xd86   :  { %1194 = vmax.xlane.f32.xlu0 %v1193_v10 }
 0xd88   :  { %v1186_v29 = vpop.f32.mrf.mxu3 }
 0xd89   :  { %v1190_v35 = vmul.f32 0.35355338, %v1186_v29 }
 0xd8b   :  { %v1192_v38 = vadd.f32 %v1190_v35, %v1939_v60 }
 0xd8d   :  { %v1196_v43 = vsel %vm55_vm0, %v1192_v38, -inf }
 0xde9   :  { %v1059_v19 = vpop.xlane.xlu0 %1058 }
 0xdea   :  { %v1063_v20 = vsub.f32 %v1055_v2, %v1059_v19 }
 0xdec   :  { %v1065_v21 = vmul.f32 1.442695, %v1063_v20 }
 0xdee   :  { %v1025_v11 = vpop.f32.mrf.mxu2  ;;  %1782 = vpow2.f32 %v1065_v21 }
 0xdf1   :  { %v1062_v26 = vpop.xlane.xlu1 %1061 }
 0xdf2   :  { %v1064_v33 = vsub.f32 %v1056_v5, %v1062_v26 }
 0xdf4   :  { %v2152_v28 = vpop.eup %1782  ;;  %v1067_v37 = vmul.f32 1.442695, %v1064_v33 }
 0xdf6   :  { %v1027_v12 = vpop.f32.mrf.mxu2 }
 0xdf7   :  { %v1030_v14 = vpack.c.bf16 %v1027_v12, %v1025_v11 }
 0xdf9   :  { %1667 = vmatmul.msk.bf16.vlgmr.msrb.gmra.mxu2 %vm175_vm11, %v1030_v14  ;;  %v1195_v22 = vpop.xlane.xlu0 %1194 }
 0xdfa   :  { %v1199_v24 = vsub.f32 %v1191_v9, %v1195_v22 }
 0xdfc   :  { %v1201_v53 = vmul.f32 1.442695, %v1199_v24 }
 0xdfe   :  { %1784 = vpow2.f32 %v1201_v53 }
 0xdff   :  { %1786 = vpow2.f32 %v1067_v37 }
 0xe04   :  { %v2159_v39 = vpop.eup %1784 }
 0xe05   :  { %v1205_v44 = vsel %vm55_vm0, %v2159_v39, 0.0  ;;  %v2164_v47 = vpop.eup %1786 }
 0xe06   :  { %v1072_v34 = vsel %vm55_vm0, %v2164_v47, 0.0 }
 0xe09   :  { %1671 = vmatmul.msk.bf16.vlgmr.msra.gmra.mxu2 %vm175_vm11, %v1286_v16 }
 0xe7c   :  { %v2146_v17 = vpop.f32.mrf.mxu2 }
 0xe84   :  { %v2148_v18 = vpop.f32.mrf.mxu2 }
 0xe8c   :  { %v1302_v45 = vpop.f32.mrf.mxu2 }
 0xe8d   :  { %v1307_v41 = vmul.f32 0.35355338, %v1302_v45 }
 0xe8f   :  { %v1309_v23 = vadd.f32 %v1307_v41, %v1933_v55  ;;  %v1069_v55 = vsel %vm55_vm0, %v2152_v28, 0.0 }
 0xe91   :  { %v1311_v25 = vsel %vm55_vm0, %v1309_v23, -inf }
 0xe92   :  { %1312 = vmax.xlane.f32.xlu0 %v1311_v25 }
 0xe94   :  { %v1304_v62 = vpop.f32.mrf.mxu2 }
 0xe95   :  { %v1308_v27 = vmul.f32 0.35355338, %v1304_v62 }
 0xe97   :  { %v1310_v30 = vadd.f32 %v1308_v27, %v1939_v60 }
 0xe99   :  { %v1314_v36 = vsel %vm55_vm0, %v1310_v30, -inf }
 0xe9a   :  { %1315 = vmax.xlane.f32.xlu1 %v1314_v36  ;;  %1070 = vadd.xlane.f32.xlu0 %v1069_v55 }
 0xea2   :  { %1206 = vadd.xlane.f32.xlu0 %v1205_v44  ;;  %1197 = vmax.xlane.f32.xlu1 %v1196_v43 }
 0xeaa   :  { %1073 = vadd.xlane.f32.xlu1 %v1072_v34 }
 0xf05   :  { %v1313_v48 = vpop.xlane.xlu0 %1312 }
 0xf06   :  { %v1317_v49 = vsub.f32 %v1309_v23, %v1313_v48 }
 0xf08   :  { %v1319_v50 = vmul.f32 1.442695, %v1317_v49 }
 0xf0a   :  { %1788 = vpow2.f32 %v1319_v50 }
 0xf0d   :  { %v1316_v60 = vpop.xlane.xlu1 %1315  ;;  %v1071_v2 = vpop.xlane.xlu0 %1070 }
 0xf0e   :  { %v1318_v57 = vsub.f32 %v1310_v30, %v1316_v60  ;;  %v1086_v19 = vand.u32 2147483648, %v1071_v2  ;;  %vm1080_vm15 = vweird.f32 %v1071_v2  ;;  %v1084_v20 = vand.u32 2147483647, %v1071_v2 }
 0xf10   :  { %v2168_v51 = vpop.eup %1788  ;;  %v1321_v59 = vmul.f32 1.442695, %v1318_v57  ;;  %v1087_v41 = vor.u32 1.1754944e-38, %v1086_v19  ;;  %vm1085_vm3 = vcmp.eq.f32.partialorder %v1084_v20, 8.507059e+37 }
 0xf11   :  { %v1323_v52 = vsel %vm55_vm0, %v2168_v51, 0.0 }
 0xf12   :  { %1324 = vadd.xlane.f32.xlu0 %v1323_v52 }
 0xf15   :  { %v1198_v54 = vpop.xlane.xlu1 %1197  ;;  %v2184_v7 = vpop.xlane.xlu0 %1206 }
 0xf16   :  { %v1200_v13 = vsub.f32 %v1192_v38, %v1198_v54 }
 0xf18   :  { %v1203_v58 = vmul.f32 1.442695, %v1200_v13 }
 0xf1a   :  { %1790 = vpow2.f32 %v1203_v58 }
 0xf1b   :  { %1792 = vpow2.f32 %v1321_v59 }
 0xf1d   :  { %v1074_v1 = vpop.xlane.xlu1 %1073 }
 0xf1e   :  { %1794 = vrcp.f32 %v1074_v1  ;;  %v1101_v12 = vand.u32 2147483648, %v1074_v1  ;;  %vm1095_vm13 = vweird.f32 %v1074_v1  ;;  %v1099_v16 = vand.u32 2147483647, %v1074_v1 }
 0xf1f   :  { %1796 = vrcp.f32 %v1071_v2 }
 0xf20   :  { %v2172_v31 = vpop.eup %1790  ;;  %v1102_v45 = vor.u32 1.1754944e-38, %v1101_v12  ;;  %vm1100_vm2 = vcmp.eq.f32.partialorder %v1099_v16, 8.507059e+37 }
 0xf21   :  { %v1208_v61 = vsel %vm55_vm0, %v2172_v31, 0.0  ;;  %v2178_v15 = vpop.eup %1792 }
 0xf22   :  { %1209 = vadd.xlane.f32.xlu1 %v1208_v61  ;;  %v1326_v63 = vsel %vm55_vm0, %v2178_v15, 0.0 }
 0xf24   :  { %v1795_v3 = vpop.eup %1794 }
 0xf25   :  { %v1797_v4 = vpop.eup %1796  ;;  %v1091_v32 = vmul.f32 %v1795_v3, %v1074_v1  ;;  %vm1096_vm8 = vweird.f32 %v1795_v3 }
 0xf26   :  { %1106 = vrot.lane.b32.xlu0 %v2107_v56, %s1844_s5  ;;  %v1076_v5 = vmul.f32 %v1797_v4, %v1071_v2  ;;  %vm1081_vm12 = vweird.f32 %v1797_v4  ;;  %vm1097_vm14 = vmor %vm1095_vm13, %vm1096_vm8 }
 0xf27   :  { %v1092_v6 = vsub.f32 1.0, %v1091_v32  ;;  %vm1082_vm1 = vmor %vm1080_vm15, %vm1081_vm12 }
 0xf28   :  { %v1077_v8 = vsub.f32 1.0, %v1076_v5 }
 0xf29   :  { %v1093_v9 = vmul.f32 %v1795_v3, %v1092_v6  ;;  %v1222_v6 = vand.u32 2147483648, %v2184_v7 }
 0xf2a   :  { %1327 = vadd.xlane.f32.xlu1 %v1326_v63  ;;  %v1078_v10 = vmul.f32 %v1797_v4, %v1077_v8 }
 0xf2b   :  { %v1094_v11 = vadd.f32 %v1795_v3, %v1093_v9 }
 0xf2d   :  { %v1098_v21 = vsel %vm1097_vm14, %v1795_v3, %v1094_v11 }
 0xf2e   :  { %v1103_v23 = vsel %vm1100_vm2, %v1102_v45, %v1098_v21  ;;  %v1223_v21 = vor.u32 1.1754944e-38, %v1222_v6 }
 0xf2f   :  { %v1104_v53 = vmul.f32 %v2164_v47, %v1103_v23 }
 0xf43   :  { %1242 = vrot.lane.b32.xlu1 %v2107_v56, %s1848_s11  ;;  %v1079_v56 = vadd.f32 %v1797_v4, %v1078_v10  ;;  %v1220_v10 = vand.u32 2147483647, %v2184_v7 }
 0xf45   :  { %v1083_v22 = vsel %vm1082_vm1, %v1797_v4, %v1079_v56 }
 0xf46   :  { %v1088_v24 = vsel %vm1085_vm3, %v1087_v41, %v1083_v22  ;;  %vm1216_vm3 = vweird.f32 %v2184_v7 }
 0xf47   :  { %v1089_v26 = vmul.f32 %v2152_v28, %v1088_v24 }
 0xf49   :  { %v1105_v30 = vpack.c.bf16 %v1104_v53, %v1089_v26 }
 0xf85   :  { %v2186_v14 = vpop.xlane.xlu0 %1324 }
 0xf86   :  { %1798 = vrcp.f32 %v2186_v14  ;;  %vm1334_vm6 = vweird.f32 %v2186_v14  ;;  %v1340_v60 = vand.u32 2147483648, %v2186_v14  ;;  %v1338_v54 = vand.u32 2147483647, %v2186_v14 }
 0xf87   :  { %1800 = vrcp.f32 %v2184_v7 }
 0xf88   :  { %v1341_v2 = vor.u32 1.1754944e-38, %v1340_v60  ;;  %vm1339_vm15 = vcmp.eq.f32.partialorder %v1338_v54, 8.507059e+37 }
 0xf8c   :  { %v1799_v25 = vpop.eup %1798 }
 0xf8d   :  { %v1330_v29 = vmul.f32 %v1799_v25, %v2186_v14  ;;  %v1801_v33 = vpop.eup %1800  ;;  %vm1335_vm5 = vweird.f32 %v1799_v25 }
 0xf8e   :  { %v1212_v38 = vmul.f32 %v1801_v33, %v2184_v7  ;;  %vm2197_vm7 = vmor %vm1334_vm6, %vm1335_vm5  ;;  %vm1217_vm8 = vweird.f32 %v1801_v33 }
 0xf8f   :  { %v1331_v36 = vsub.f32 1.0, %v1330_v29 }
 0xf90   :  { %v1213_v47 = vsub.f32 1.0, %v1212_v38 }
 0xf91   :  { %v1332_v44 = vmul.f32 %v1799_v25, %v1331_v36 }
 0xf92   :  { %v1214_v50 = vmul.f32 %v1801_v33, %v1213_v47 }
 0xf93   :  { %v1333_v28 = vadd.f32 %v1799_v25, %v1332_v44 }
 0xf94   :  { %v1215_v1 = vadd.f32 %v1801_v33, %v1214_v50 }
 0xf95   :  { %v1210_v62 = vpop.xlane.xlu1 %1209  ;;  %v1337_v57 = vsel %vm2197_vm7, %v1799_v25, %v1333_v28  ;;  %vm1218_vm7 = vmor %vm1216_vm3, %vm1217_vm8 }
 0xf96   :  { %1802 = vrcp.f32 %v1210_v62  ;;  %vm1231_vm14 = vweird.f32 %v1210_v62  ;;  %v1237_v3 = vand.u32 2147483648, %v1210_v62  ;;  %v1235_v32 = vand.u32 2147483647, %v1210_v62 }
 0xf97   :  { %v1342_v8 = vsel %vm1339_vm15, %v1341_v2, %v1337_v57  ;;  %v1219_v16 = vsel %vm1218_vm7, %v1801_v33, %v1215_v1 }
 0xf98   :  { %v1107_v27 = vpop.permute.xlu0 %1106  ;;  %v1238_v14 = vor.u32 1.1754944e-38, %v1237_v3  ;;  %v1343_v19 = vmul.f32 %v2168_v51, %v1342_v8  ;;  %v839_v51 = vld [vmem:[%s2289_s2 + $0x64] sm:$0xf] }
 0xf99   :  { %1119 = vmatpush.bf16.msra.mxu0 %v1107_v27 }
 0xf9c   :  { %1665 = vmatmul.msk.bf16.vlgmr.msra.gmra.mxu0 %vm55_vm0, %v1105_v30  ;;  %v1803_v35 = vpop.eup %1802 }
 0xf9d   :  { %v1227_v55 = vmul.f32 %v1803_v35, %v1210_v62  ;;  %v1328_v37 = vpop.xlane.xlu1 %1327  ;;  %vm1232_vm12 = vweird.f32 %v1803_v35 }
 0xf9e   :  { %1804 = vrcp.f32 %v1328_v37  ;;  %v1355_v58 = vand.u32 2147483648, %v1328_v37  ;;  %v1353_v63 = vand.u32 2147483647, %v1328_v37  ;;  %vm2204_vm1 = vmor %vm1231_vm14, %vm1232_vm12  ;;  %vm1349_vm2 = vweird.f32 %v1328_v37 }
 0xf9f   :  { %v1228_v43 = vsub.f32 1.0, %v1227_v55  ;;  %vm1236_vm12 = vcmp.eq.f32.partialorder %v1235_v32, 8.507059e+37 }
 0xfa0   :  { %v1356_v9 = vor.u32 1.1754944e-38, %v1355_v58  ;;  %vm1354_vm6 = vcmp.eq.f32.partialorder %v1353_v63, 8.507059e+37 }
 0xfa1   :  { %v1229_v48 = vmul.f32 %v1803_v35, %v1228_v43 }
 0xfa3   :  { %v1230_v59 = vadd.f32 %v1803_v35, %v1229_v48 }
 0xfa4   :  { %v1805_v34 = vpop.eup %1804 }
 0xfa5   :  { %v1345_v49 = vmul.f32 %v1805_v34, %v1328_v37  ;;  %vm1350_vm13 = vweird.f32 %v1805_v34  ;;  %v1234_v11 = vsel %vm2204_vm1, %v1803_v35, %v1230_v59 }
 0xfa6   :  { %vm1351_vm5 = vmor %vm1349_vm2, %vm1350_vm13  ;;  %v1239_v45 = vsel %vm1236_vm12, %v1238_v14, %v1234_v11  ;;  %vm1221_vm13 = vcmp.eq.f32.partialorder %v1220_v10, 8.507059e+37 }
 0xfa7   :  { %v1346_v13 = vsub.f32 1.0, %v1345_v49  ;;  %v1224_v7 = vsel %vm1221_vm13, %v1223_v21, %v1219_v16  ;;  %v1240_v41 = vmul.f32 %v2172_v31, %v1239_v45  ;;  %v840_v31 = vld [vmem:[%s2289_s2 + $0x68] sm:$0xf]  ;;  %v1405_v49 = vperm.slane %v2102_v46, 1 }
 0xfa8   :  { %v1225_v23 = vmul.f32 %v2159_v39, %v1224_v7  ;;  %v841_v39 = vld [vmem:[%s2289_s2 + $0x6c] sm:$0xf]  ;;  %v1267_v62 = vsel %vm179_vm10, %v840_v31, 0 }
 0xfa9   :  { %v1347_v61 = vmul.f32 %v1805_v34, %v1346_v13  ;;  %v1385_v26 = vsel %vm179_vm10, %v841_v39, 0 }
 0xfaa   :  { %v1241_v25 = vpack.c.bf16 %v1240_v41, %v1225_v23 }
 0xfab   :  { %v1348_v5 = vadd.f32 %v1805_v34, %v1347_v61 }
 0xfad   :  { %v1352_v12 = vsel %vm1351_vm5, %v1805_v34, %v1348_v5 }
 0xfae   :  { %v1357_v56 = vsel %vm1354_vm6, %v1356_v9, %v1352_v12  ;;  %v1710_v12 = vld [vmem:[%s2289_s2 + $0x70] sm:$0xff] }
 0xfaf   :  { %v1358_v20 = vmul.f32 %v2178_v15, %v1357_v56  ;;  %v1131_v15 = vsel %vm179_vm10, %v839_v51, 0 }
 0xfb0   :  { %1140 = vmatpush.bf16.msrb.mxu1 %v1131_v15 }
 0xfb1   :  { %v1359_v22 = vpack.c.bf16 %v1358_v20, %v1343_v19 }
 0xfb3   :  { %1672 = vmatmul.msk.bf16.vlgmr.msra.gmra.mxu3 %vm55_vm0, %v1359_v22 }
 0xfb4   :  { %1276 = vmatpush.bf16.msra.mxu1 %v1267_v62 }
 0xfb5   :  { %v1243_v24 = vpop.permute.xlu1 %1242 }
 0xfb6   :  { %1255 = vmatpush.bf16.msrb.mxu0 %v1243_v24 }
 0xfb9   :  { %1669 = vmatmul.msk.bf16.vlgmr.msrb.gmra.mxu0 %vm55_vm0, %v1241_v25 }
 0xfba   :  { %1394 = vmatpush.bf16.msra.mxu0 %v1385_v26  ;;  %v1455_v26 = vperm.slane %v2102_v46, 5 }
0x1019   :  { %v1121_v53 = vpop.f32.mrf.mxu0 }
0x1021   :  { %v1123_v27 = vpop.f32.mrf.mxu0 }
0x1022   :  { %v1126_v29 = vpack.c.bf16 %v1123_v27, %v1121_v53  ;;  %v1452_v53 = vperm.slane %v2102_v46, 4 }
0x1024   :  { %1666 = vmatmul.msk.bf16.vlgmr.msrb.gmra.mxu1 %vm175_vm11, %v1126_v29 }
0x1036   :  { %v1257_v30 = vpop.f32.mrf.mxu0  ;;  %v1375_v33 = vpop.f32.mrf.mxu3 }
0x103e   :  { %v1259_v35 = vpop.f32.mrf.mxu0  ;;  %v1377_v36 = vpop.f32.mrf.mxu3 }
0x103f   :  { %v1262_v55 = vpack.c.bf16 %v1259_v35, %v1257_v30  ;;  %v1380_v37 = vpack.c.bf16 %v1377_v36, %v1375_v33 }
0x1041   :  { %1670 = vmatmul.msk.bf16.vlgmr.msra.gmra.mxu1 %vm175_vm11, %v1262_v55  ;;  %1673 = vmatmul.msk.bf16.vlgmr.msra.gmra.mxu0 %vm175_vm11, %v1380_v37  ;;  %v1715_v55 = vld [vmem:[%s2289_s2 + $0x98] sm:$0xff]  ;;  %v1714_v37 = vld [vmem:[%s2289_s2 + $0x90] sm:$0xff] }
0x1042   :  { %1524 = vmatpush.bf16.msrb.mxu2 %v1715_v55 }
0x1046   :  { %1525 = vmatpush.bf16.msrb.mxu2 %v1714_v37 }
0x10a1   :  { %v1142_v38 = vpop.f32.mrf.mxu1 }
0x10a2   :  { %v1163_v43 = vadd.f32 %v2146_v17, %v1142_v38  ;;  %v1713_v38 = vld [vmem:[%s2289_s2 + $0x88] sm:$0xff] }
0x10a3   :  { %1526 = vmatpush.bf16.msrb.mxu2 %v1713_v38 }
0x10a9   :  { %v1144_v44 = vpop.f32.mrf.mxu1 }
0x10aa   :  { %v1165_v60 = vadd.f32 %v2148_v18, %v1144_v44  ;;  %v1712_v44 = vld [vmem:[%s2289_s2 + $0x80] sm:$0xff] }
0x10ab   :  { %1527 = vmatpush.bf16.msrb.mxu2 %v1712_v44 }
0x10be   :  { %v1278_v47 = vpop.f32.mrf.mxu1  ;;  %v1396_v34 = vpop.f32.mrf.mxu0 }
0x10bf   :  { %v1283_v28 = vadd.f32 %v1278_v47, %v1163_v43  ;;  %v1459_v47 = vperm.slane %v2102_v46, 2 }
0x10c1   :  { %v1401_v48 = vadd.f32 %v1396_v34, %v1283_v28 }
0x10c3   :  { %v1403_v50 = vadd.f32 %v1401_v48, %v2092_v40 }
0x10c5   :  { %v1406_v52 = vadd.f32 %v1405_v49, %v1403_v50 }
0x10c6   :  { %v1280_v54 = vpop.f32.mrf.mxu1  ;;  %v1398_v58 = vpop.f32.mrf.mxu0 }
0x10c7   :  { %v1284_v13 = vadd.f32 %v1280_v54, %v1165_v60  ;;  %v1408_v57 = vsel %vm106_vm9, %v1406_v52, 0.0 }
0x10c8   :  { %1409 = vadd.xlane.f32.xlu0 %v1408_v57 }
0x10c9   :  { %v1402_v59 = vadd.f32 %v1398_v58, %v1284_v13 }
0x10cb   :  { %v1404_v17 = vadd.f32 %v1402_v59, %v2094_v42  ;;  %v1711_v42 = vld [vmem:[%s2289_s2 + $0x78] sm:$0xff]  ;;  %s1851_s2 = smov [#allocation2]  }
0x10cc   :  { %1481 = vmatpush.bf16.msrb.mxu1 %v1711_v42  ;;  %s1592_s28 = sshll.u32 %s1851_s2, 4  ;;  %s1593_s28 = int_to_ptr.vmem [resolvable:$true] %s1592_s28 }
0x10cd   :  { %v1407_v61 = vadd.f32 %v1405_v49, %v1404_v17 }
0x10cf   :  { %v1411_v63 = vsel %vm106_vm9, %v1407_v61, 0.0 }
0x10d0   :  { %1412 = vadd.xlane.f32.xlu2 %v1411_v63  ;;  %1482 = vmatpush.bf16.msrb.mxu1 %v1710_v12 }
0x113b   :  { %v1410_v1 = vpop.xlane.xlu0 %1409 }
0x113c   :  { %v1414_v2 = vmul.f32 %v1410_v1, %v2044_v0 }
0x113e   :  { %v1416_v40 = vsub.f32 %v1406_v52, %v1414_v2  ;;  %v1492_v52 = vperm.slane %v2102_v46, 3 }
0x1140   :  { %v1418_v3 = vmul.f32 %v1416_v40, %v1416_v40 }
0x1142   :  { %v1420_v18 = vsel %vm106_vm9, %v1418_v3, 0.0 }
0x1143   :  { %1421 = vadd.xlane.f32.xlu1 %v1420_v18  ;;  %v1413_v4 = vpop.xlane.xlu2 %1412 }
0x1144   :  { %v1415_v32 = vmul.f32 %v1413_v4, %v2044_v0 }
0x1146   :  { %v1417_v5 = vsub.f32 %v1407_v61, %v1415_v32 }
0x1148   :  { %v1419_v6 = vmul.f32 %v1417_v5, %v1417_v5 }
0x114a   :  { %v1423_v8 = vsel %vm106_vm9, %v1419_v6, 0.0 }
0x114b   :  { %1424 = vadd.xlane.f32.xlu0 %v1423_v8 }
0x11b6   :  { %v1422_v9 = vpop.xlane.xlu1 %1421 }
0x11b7   :  { %v1426_v10 = vmul.f32 %v1422_v9, %v2044_v0 }
0x11b9   :  { %v1428_v11 = vadd.f32 1e-05, %v1426_v10 }
0x11bb   :  { %1806 = vrsqrt.f32 %v1428_v11  ;;  %vm1436_vm10 = vweird.f32 %v1428_v11 }
0x11be   :  { %v1425_v14 = vpop.xlane.xlu0 %1424 }
0x11bf   :  { %v1427_v56 = vmul.f32 %v1425_v14, %v2044_v0 }
0x11c1   :  { %v1807_v16 = vpop.eup %1806  ;;  %v1429_v19 = vadd.f32 1e-05, %v1427_v56 }
0x11c2   :  { %v1431_v20 = vmul.f32 %v1807_v16, %v1428_v11  ;;  %vm1437_vm0 = vweird.f32 %v1807_v16 }
0x11c3   :  { %1808 = vrsqrt.f32 %v1429_v19  ;;  %vm1438_vm11 = vmor %vm1436_vm10, %vm1437_vm0  ;;  %vm1446_vm14 = vweird.f32 %v1429_v19 }
0x11c4   :  { %v1432_v21 = vmul.f32 %v1807_v16, %v1431_v20 }
0x11c6   :  { %v1433_v45 = vmul.f32 0.5, %v1432_v21 }
0x11c8   :  { %v1434_v22 = vsub.f32 1.5, %v1433_v45 }
0x11c9   :  { %v1809_v7 = vpop.eup %1808 }
0x11ca   :  { %v1435_v41 = vmul.f32 %v1807_v16, %v1434_v22  ;;  %v1441_v23 = vmul.f32 %v1809_v7, %v1429_v19  ;;  %vm1447_vm8 = vweird.f32 %v1809_v7 }
0x11cb   :  { %vm1448_vm15 = vmor %vm1446_vm14, %vm1447_vm8 }
0x11cc   :  { %v1442_v24 = vmul.f32 %v1809_v7, %v1441_v23  ;;  %v1439_v25 = vsel %vm1438_vm11, %v1807_v16, %v1435_v41  ;;  %v1580_v41 = vperm.slane %v2102_v46, 6 }
0x11cd   :  { %v1450_v31 = vmul.f32 %v1439_v25, %v1416_v40 }
0x11ce   :  { %v1443_v51 = vmul.f32 0.5, %v1442_v24 }
0x11cf   :  { %v1453_v27 = vmul.f32 %v1452_v53, %v1450_v31 }
0x11d0   :  { %v1444_v15 = vsub.f32 1.5, %v1443_v51 }
0x11d1   :  { %v1456_v33 = vadd.f32 %v1455_v26, %v1453_v27 }
0x11d2   :  { %v1445_v39 = vmul.f32 %v1809_v7, %v1444_v15 }
0x11d4   :  { %v1449_v62 = vsel %vm1448_vm15, %v1809_v7, %v1445_v39 }
0x11d5   :  { %v1451_v29 = vmul.f32 %v1449_v62, %v1417_v5 }
0x11d7   :  { %v1454_v30 = vmul.f32 %v1452_v53, %v1451_v29 }
0x11d9   :  { %v1457_v35 = vadd.f32 %v1455_v26, %v1454_v30 }
0x11db   :  { %v1458_v36 = vpack.c.bf16 %v1457_v35, %v1456_v33 }
0x11dd   :  { %1682 = vmatmul.msk.bf16.vlgmr.msrb.gmra.mxu1 %vm106_vm9, %v1458_v36 }
0x125a   :  { %v1484_v43 = vpop.f32.mrf.mxu1 }
0x125b   :  { %v1485_v34 = vadd.f32 %v1484_v43, %v1459_v47 }
0x125d   :  { %v1489_v49 = vmax.f32 %v1485_v34, 0.0 }
0x1262   :  { %v1486_v28 = vpop.f32.mrf.mxu1 }
0x1263   :  { %v1487_v48 = vadd.f32 %v1486_v28, %v1459_v47 }
0x1265   :  { %v1490_v50 = vmax.f32 %v1487_v48, 0.0 }
0x1267   :  { %v1491_v60 = vpack.c.bf16 %v1490_v50, %v1489_v49 }
0x1269   :  { %1699 = vmatmul.msk.bf16.vlgmr.msrb.gmra.mxu2 %vm764_vm4, %v1491_v60 }
0x12ec   :  { %v1529_v54 = vpop.f32.mrf.mxu2 }
0x12ed   :  { %v1530_v13 = vadd.f32 %v1529_v54, %v1492_v52 }
0x12ef   :  { %v1534_v57 = vadd.f32 %v1530_v13, %v1456_v33 }
0x12f1   :  { %v1536_v58 = vsel %vm106_vm9, %v1534_v57, 0.0 }
0x12f2   :  { %1537 = vadd.xlane.f32.xlu2 %v1536_v58 }
0x12f4   :  { %v1531_v59 = vpop.f32.mrf.mxu2 }
0x12f5   :  { %v1532_v17 = vadd.f32 %v1531_v59, %v1492_v52 }
0x12f7   :  { %v1535_v61 = vadd.f32 %v1532_v17, %v1457_v35 }
0x12f9   :  { %v1539_v63 = vsel %vm106_vm9, %v1535_v61, 0.0 }
0x12fa   :  { %1540 = vadd.xlane.f32.xlu0 %v1539_v63 }
0x1365   :  { %v1538_v1 = vpop.xlane.xlu2 %1537 }
0x1366   :  { %v1542_v2 = vmul.f32 %v1538_v1, %v2044_v0 }
0x1368   :  { %v1544_v40 = vsub.f32 %v1534_v57, %v1542_v2 }
0x136a   :  { %v1546_v3 = vmul.f32 %v1544_v40, %v1544_v40 }
0x136c   :  { %v1548_v18 = vsel %vm106_vm9, %v1546_v3, 0.0 }
0x136d   :  { %v1541_v4 = vpop.xlane.xlu0 %1540  ;;  %1549 = vadd.xlane.f32.xlu1 %v1548_v18 }
0x136e   :  { %v1543_v32 = vmul.f32 %v1541_v4, %v2044_v0 }
0x1370   :  { %v1545_v5 = vsub.f32 %v1535_v61, %v1543_v32 }
0x1372   :  { %v1547_v6 = vmul.f32 %v1545_v5, %v1545_v5 }
0x1374   :  { %v1551_v8 = vsel %vm106_vm9, %v1547_v6, 0.0 }
0x1375   :  { %1552 = vadd.xlane.f32.xlu2 %v1551_v8 }
0x13e0   :  { %v1550_v42 = vpop.xlane.xlu1 %1549 }
0x13e1   :  { %v1554_v9 = vmul.f32 %v1550_v42, %v2044_v0 }
0x13e3   :  { %v1556_v10 = vadd.f32 1e-05, %v1554_v9 }
0x13e5   :  { %1810 = vrsqrt.f32 %v1556_v10  ;;  %vm1564_vm1 = vweird.f32 %v1556_v10 }
0x13e8   :  { %v1553_v11 = vpop.xlane.xlu2 %1552 }
0x13e9   :  { %v1555_v12 = vmul.f32 %v1553_v11, %v2044_v0  ;;  %v1583_v0 = vperm.slane %v2102_v46, 7 }
0x13eb   :  { %v1811_v14 = vpop.eup %1810  ;;  %v1557_v56 = vadd.f32 1e-05, %v1555_v12 }
0x13ec   :  { %v1559_v16 = vmul.f32 %v1811_v14, %v1556_v10  ;;  %vm1565_vm4 = vweird.f32 %v1811_v14 }
0x13ed   :  { %1812 = vrsqrt.f32 %v1557_v56  ;;  %vm1566_vm2 = vmor %vm1564_vm1, %vm1565_vm4  ;;  %vm1574_vm5 = vweird.f32 %v1557_v56 }
0x13ee   :  { %v1560_v19 = vmul.f32 %v1811_v14, %v1559_v16 }
0x13f0   :  { %v1561_v20 = vmul.f32 0.5, %v1560_v19 }
0x13f2   :  { %v1562_v21 = vsub.f32 1.5, %v1561_v20 }
0x13f3   :  { %v1813_v45 = vpop.eup %1812 }
0x13f4   :  { %v1563_v22 = vmul.f32 %v1811_v14, %v1562_v21  ;;  %v1569_v7 = vmul.f32 %v1813_v45, %v1557_v56  ;;  %vm1575_vm3 = vweird.f32 %v1813_v45 }
0x13f5   :  { %vm1576_vm6 = vmor %vm1574_vm5, %vm1575_vm3 }
0x13f6   :  { %v1567_v23 = vsel %vm1566_vm2, %v1811_v14, %v1563_v22  ;;  %v1570_v24 = vmul.f32 %v1813_v45, %v1569_v7 }
0x13f7   :  { %v1578_v25 = vmul.f32 %v1567_v23, %v1544_v40 }
0x13f8   :  { %v1571_v51 = vmul.f32 0.5, %v1570_v24 }
0x13f9   :  { %v1581_v15 = vmul.f32 %v1580_v41, %v1578_v25 }
0x13fa   :  { %v1572_v53 = vsub.f32 1.5, %v1571_v51 }
0x13fb   :  { %v1584_v31 = vadd.f32 %v1583_v0, %v1581_v15 }
0x13fc   :  { %v1573_v39 = vmul.f32 %v1813_v45, %v1572_v53 }
0x13fd   :  { %1586 = vst.msk [vmem:[#allocation2] sm:$0xff] %vm106_vm9, %v1584_v31 }
0x13fe   :  { %v1577_v62 = vsel %vm1576_vm6, %v1813_v45, %v1573_v39 }
0x13ff   :  { %v1579_v26 = vmul.f32 %v1577_v62, %v1545_v5 }
0x1401   :  { %v1582_v27 = vmul.f32 %v1580_v41, %v1579_v26 }
0x1403   :  { %v1585_v46 = vadd.f32 %v1583_v0, %v1582_v27 }
0x1405   :  { %1587 = vst.msk [vmem:[#allocation2 + $0x8] sm:$0xff] %vm106_vm9, %v1585_v46 }
0x1406   :  { %1600 = dma.vmem_to_hbm [thread:$0]  %s1593_s28, 256, %s1595_s9, [#allocation3], %s1852_s10, %s1852_s10, %s1853_s13  }
0x1407   :  { %1838 = dma.done.wait [#allocation3], 256  }
0x1408   :  { %1839 = vsyncadd [#allocation3], 4294967040 }
0x1409   :  { %1605 = vsyncpa [#allocation3], 1 }

</bundles_post_ra>
